<compile_context>
chip_gen: v6e
topology: v6e:2x2x1
jax: 0.10.0
libtpu: 0.0.40
codegen_flags: <defaults>
</compile_context>

<pallas_src>
import numpy as np

import jax
import jax.numpy as jnp
from jax.experimental import pallas as pl
from jax.experimental.pallas import tpu as pltpu


# --------------------------------------------------------------------------- #
# network geometry (fixed by the PyTorch module)
# --------------------------------------------------------------------------- #

# (kind, Cin, Cout, K, stride, output_padding)
_LAYER_DEFS = (
    ("conv",   1,  3, 5, 2, 0),   # layer1
    ("conv",   3,  6, 5, 2, 0),   # layer2
    ("conv",   6, 12, 3, 1, 0),   # layer3
    ("convT", 12,  6, 3, 1, 0),   # layer4
    ("convT",  6,  3, 5, 2, 1),   # layer5
    ("convT",  3,  1, 5, 2, 1),   # layer6
)
_N_LAYERS = len(_LAYER_DEFS)
_LANE = 128
_SUBLANE = 8


def _layer_geometry(h_in, w_in):
    """Per-layer (Hin, Win, Cin, Hout, Wout, Cout)."""
    geoms = []
    h, w = h_in, w_in
    for kind, cin, cout, k, s, op in _LAYER_DEFS:
        if kind == "conv":
            ho = (h - k) // s + 1
            wo = (w - k) // s + 1
        else:  # ConvTranspose2d, padding=0, dilation=1
            ho = (h - 1) * s + k + op
            wo = (w - 1) * s + k + op
        geoms.append((h, w, cin, ho, wo, cout))
        h, w = ho, wo
    return geoms


# --------------------------------------------------------------------------- #
# weight packing: fold all six convs into ONE dense matrix + ONE bias row
# --------------------------------------------------------------------------- #

def _toeplitz_map(kind, geom, k, stride):
    """Static int32 map (Din, Dout): index into the layer's flattened conv
    kernel, or `kernel.size` meaning "structural zero".  Pure numpy (static)."""
    hin, win, cin, hout, wout, cout = geom
    ih = np.arange(hin)[:, None, None, None, None, None]
    iw = np.arange(win)[None, :, None, None, None, None]
    ci = np.arange(cin)[None, None, :, None, None, None]
    oh = np.arange(hout)[None, None, None, :, None, None]
    ow = np.arange(wout)[None, None, None, None, :, None]
    co = np.arange(cout)[None, None, None, None, None, :]
    if kind == "conv":
        # out[oh,ow,co] += in[oh*s+kh, ow*s+kw, ci] * w[co,ci,kh,kw]   (OIHW)
        kh = ih - oh * stride
        kw = iw - ow * stride
        flat = ((co * cin + ci) * k + kh) * k + kw
    else:
        # out[ih*s+kh, iw*s+kw, co] += in[ih,iw,ci] * w[ci,co,kh,kw]   (IOHW)
        kh = oh - ih * stride
        kw = ow - iw * stride
        flat = ((ci * cout + co) * k + kh) * k + kw
    valid = (kh >= 0) & (kh < k) & (kw >= 0) & (kw < k)
    sentinel = cin * cout * k * k
    idx = np.where(valid, flat, sentinel)
    return idx.reshape(hin * win * cin, hout * wout * cout).astype(np.int32)


def pack_params(params, h_in, w_in):
    """One-time, data-independent packing: build each layer's (Din_l, Dout_l)
    Toeplitz matrix, then collapse the whole affine chain into

        W_total : (Hin*Win*Cin, Dout_pad)   with Dout_pad a multiple of 128
        b_total : (1, Dout_pad)

    Padded columns are structural zeros; the wrapper slices them off."""
    geoms = _layer_geometry(h_in, w_in)
    w_tot = None
    b_tot = None
    for li, (ldef, geom) in enumerate(zip(_LAYER_DEFS, geoms)):
        kind, cin, cout, k, s, _op = ldef
        w = params[f"w{li + 1}"].astype(jnp.float32)
        b = params[f"b{li + 1}"].astype(jnp.float32)
        idx = _toeplitz_map(kind, geom, k, s)                       # static
        w_ext = jnp.concatenate([w.reshape(-1), jnp.zeros((1,), jnp.float32)])
        w_big = jnp.take(w_ext, idx, axis=0)                        # (Din_l, Dout_l)
        hout, wout = geom[3], geom[4]
        b_big = jnp.tile(b, hout * wout).reshape(1, -1)             # (1, Dout_l), NHWC

        if w_tot is None:
            w_tot, b_tot = w_big, b_big
        else:
            w_tot = jnp.dot(w_tot, w_big, preferred_element_type=jnp.float32)
            b_tot = jnp.dot(b_tot, w_big,
                            preferred_element_type=jnp.float32) + b_big

    d_out = w_tot.shape[1]
    d_out_pad = -(-d_out // _LANE) * _LANE    # lane-dense output slab
    w_tot = jnp.pad(w_tot, ((0, 0), (0, d_out_pad - d_out)))
    b_tot = jnp.pad(b_tot, ((0, 0), (0, d_out_pad - d_out)))
    return w_tot, b_tot, d_out


# --------------------------------------------------------------------------- #
# the fused Pallas kernel: a single lane-dense MXU GEMM + bias add
# --------------------------------------------------------------------------- #

def _collapsed_kernel(x_ref, w_ref, b_ref, o_ref):
    o_ref[...] = (
        jnp.dot(x_ref[...], w_ref[...], preferred_element_type=jnp.float32)
        + b_ref[...]
    ).astype(o_ref.dtype)


def _pick_tiling(n):
    """Choose (tile_m, padded_m).  Pad batch only to the tile (multiple of 8),
    keep >= 2 'parallel' grid steps for moderate batches (v7x dual-TC), and use
    256-row tiles for large batches (VMEM-safe on v7x's 64 MiB as well)."""
    m8 = -(-max(n, 1) // _SUBLANE) * _SUBLANE
    if m8 <= _SUBLANE:
        return _SUBLANE, _SUBLANE
    if m8 <= 512:
        tile = -(-m8 // (2 * _SUBLANE)) * _SUBLANE   # ~half the batch per tile
        return tile, 2 * tile
    tile = 256
    return tile, -(-m8 // tile) * tile


@jax.jit
def autoencoder_forward(x_nchw, w_tot, b_tot):
    """Forward pass.  Accepts / returns NCHW to match the PyTorch module."""
    n, c_in, h_in, w_in = x_nchw.shape
    h_out, w_out, c_out = _layer_geometry(h_in, w_in)[-1][3:6]
    d_in = w_tot.shape[0]
    d_out_pad = w_tot.shape[1]
    d_out = h_out * w_out * c_out
    assert c_in == 1 and c_out == 1  # module constants; makes NCHW==NHWC flatten

    # Cin == 1: NCHW and NHWC flattenings coincide -> plain reshape, no copies.
    x2d = x_nchw.reshape(n, d_in).astype(jnp.float32)
    tile_m, m = _pick_tiling(n)
    x2d = jnp.pad(x2d, ((0, m - n), (0, 0)))

    y2d = pl.pallas_call(
        _collapsed_kernel,
        out_shape=jax.ShapeDtypeStruct((m, d_out_pad), jnp.float32),
        grid=(m // tile_m,),
        in_specs=[
            pl.BlockSpec((tile_m, d_in), lambda i: (i, 0)),
            # Constant-index operands: re-fetch is skipped across grid steps.
            pl.BlockSpec((d_in, d_out_pad), lambda i: (0, 0)),
            pl.BlockSpec((1, d_out_pad), lambda i: (0, 0)),
        ],
        out_specs=pl.BlockSpec((tile_m, d_out_pad), lambda i: (i, 0)),
        compiler_params=pltpu.CompilerParams(
            dimension_semantics=("parallel",)),     # M-tiles independent
    )(x2d, w_tot, b_tot)

    # Drop padded batch rows + structural-zero lane columns; Cout == 1 so the
    # NHWC->NCHW permutation is a data no-op (plain reshape).
    y = y2d[:n, :d_out].reshape(n, c_out, h_out, w_out)
    return y


# --------------------------------------------------------------------------- #
# parameter init (PyTorch-style uniform(-1/sqrt(fan_in), 1/sqrt(fan_in)))
# --------------------------------------------------------------------------- #

def init_params(key):
    keys = jax.random.split(key, 2 * _N_LAYERS)
    params = {}
    for li, (kind, cin, cout, k, s, op) in enumerate(_LAYER_DEFS):
        bound = 1.0 / np.sqrt(cin * k * k)
        wshape = (cout, cin, k, k) if kind == "conv" else (cin, cout, k, k)
        params[f"w{li + 1}"] = jax.random.uniform(
            keys[2 * li], wshape, jnp.float32, -bound, bound)
        params[f"b{li + 1}"] = jax.random.uniform(
            keys[2 * li + 1], (cout,), jnp.float32, -bound, bound)
    return params


# --------------------------------------------------------------------------- #
# pure-JAX reference (lax convolutions) for the correctness check
# --------------------------------------------------------------------------- #

def _ref_conv(x, w, b, stride):
    y = jax.lax.conv_general_dilated(
        x, w, window_strides=(stride, stride), padding="VALID",
        dimension_numbers=("NCHW", "OIHW", "NCHW"))
    return y + b.reshape(1, -1, 1, 1)


def _ref_convT(x, w_iohw, b, stride, output_padding):
    k = w_iohw.shape[-1]
    w = jnp.transpose(jnp.flip(w_iohw, axis=(2, 3)), (1, 0, 2, 3))  # -> OIHW
    y = jax.lax.conv_general_dilated(
        x, w, window_strides=(1, 1),
        padding=[(k - 1, k - 1 + output_padding)] * 2,
        lhs_dilation=(stride, stride),
        dimension_numbers=("NCHW", "OIHW", "NCHW"))
    return y + b.reshape(1, -1, 1, 1)


def reference_forward(x, p):
    x = _ref_conv(x, p["w1"], p["b1"], 2)
    x = _ref_conv(x, p["w2"], p["b2"], 2)
    x = _ref_conv(x, p["w3"], p["b3"], 1)
    x = _ref_convT(x, p["w4"], p["b4"], 1, 0)
    x = _ref_convT(x, p["w5"], p["b5"], 2, 1)
    x = _ref_convT(x, p["w6"], p["b6"], 2, 1)
    return x


# --------------------------------------------------------------------------- #
# main
# --------------------------------------------------------------------------- #

if __name__ == "__main__":
    key = jax.random.PRNGKey(0)
    kx, kp = jax.random.split(key)

    # shape consistent with the module: encoder bottleneck is (N, 12, 2, 2)
    x = jax.random.normal(kx, (2, 1, 25, 25), dtype=jnp.float32)
    params = init_params(kp)

    # one-time weight packing (collapsed single GEMM), then one kernel call
    w_tot, b_tot, _ = pack_params(params, x.shape[2], x.shape[3])

    out = jax.block_until_ready(autoencoder_forward(x, w_tot, b_tot))
    assert out.shape == (2, 1, 28, 28), out.shape

    ref = jax.block_until_ready(reference_forward(x, params))
    np.testing.assert_allclose(np.asarray(out), np.asarray(ref),
                               rtol=1e-3, atol=1e-3)

    print("KERNEL_OK")
</pallas_src>

<mosaic_0001>
module attributes {stable_mosaic.version = 11 : i64} {
  func.func @_collapsed_kernel(%arg0: i32, %arg1: memref<8x625xf32, #tpu.memory_space<vmem>>, %arg2: memref<625x896xf32, #tpu.memory_space<vmem>>, %arg3: memref<1x896xf32, #tpu.memory_space<vmem>>, %arg4: memref<8x896xf32, #tpu.memory_space<vmem>>) attributes {dimension_semantics = [#tpu.dimension_semantics<parallel>], iteration_bounds = array<i64: 1>, scalar_prefetch = 0 : i64, scratch_operands = 0 : i64, tpu.core_type = #tpu.core_type<tc>, window_params = [{transform_indices = @transform_0, window_bounds = array<i64: 8, 625>}, {pipeline_mode = #tpu.pipeline_mode<synchronous>, transform_indices = @transform_1, window_bounds = array<i64: 625, 896>}, {pipeline_mode = #tpu.pipeline_mode<synchronous>, transform_indices = @transform_2, window_bounds = array<i64: 1, 896>}, {transform_indices = @transform_3, window_bounds = array<i64: 8, 896>}]} {
    %c0 = arith.constant 0 : index
    %c0_0 = arith.constant 0 : index
    %0 = vector.load %arg1[%c0, %c0_0] : memref<8x625xf32, #tpu.memory_space<vmem>>, vector<8x625xf32>
    %c0_1 = arith.constant 0 : index
    %c0_2 = arith.constant 0 : index
    %1 = vector.load %arg2[%c0_1, %c0_2] : memref<625x896xf32, #tpu.memory_space<vmem>>, vector<625x896xf32>
    %cst = arith.constant dense<0.000000e+00> : vector<8x896xf32>
    %2 = tpu.matmul %0, %1, %cst {dimension_numbers = #tpu.dot_dimension_numbers<[1], [0], [0], [1], [0, 0, 1, 1], [], []>} : vector<8x625xf32>, vector<625x896xf32>, vector<8x896xf32> -> vector<8x896xf32>
    %c0_3 = arith.constant 0 : index
    %c0_4 = arith.constant 0 : index
    %3 = vector.load %arg3[%c0_3, %c0_4] : memref<1x896xf32, #tpu.memory_space<vmem>>, vector<1x896xf32>
    %4 = vector.broadcast %3 : vector<1x896xf32> to vector<8x896xf32>
    %5 = arith.addf %2, %4 : vector<8x896xf32>
    %c0_5 = arith.constant 0 : index
    %c0_6 = arith.constant 0 : index
    %6 = vector.load %arg4[%c0_5, %c0_6] : memref<8x896xf32, #tpu.memory_space<vmem>>, vector<8x896xf32>
    tpu.vector_store %arg4[%c0_5, %c0_6], %5 {strides = array<i32>} : memref<8x896xf32, #tpu.memory_space<vmem>>, vector<8x896xf32>,
    return
  }
  func.func @transform_0(%arg0: i32) -> (i32, i32) {
    %c0_i32 = arith.constant 0 : i32
    %c0_i32_0 = arith.constant 0 : i32
    return %arg0, %c0_i32 : i32, i32
  }
  func.func @transform_1(%arg0: i32) -> (i32, i32) {
    %c0_i32 = arith.constant 0 : i32
    %c0_i32_0 = arith.constant 0 : i32
    %c0_i32_1 = arith.constant 0 : i32
    return %c0_i32, %c0_i32_0 : i32, i32
  }
  func.func @transform_2(%arg0: i32) -> (i32, i32) {
    %c0_i32 = arith.constant 0 : i32
    %c0_i32_0 = arith.constant 0 : i32
    %c0_i32_1 = arith.constant 0 : i32
    return %c0_i32, %c0_i32_0 : i32, i32
  }
  func.func @transform_3(%arg0: i32) -> (i32, i32) {
    %c0_i32 = arith.constant 0 : i32
    %c0_i32_0 = arith.constant 0 : i32
    return %arg0, %c0_i32 : i32, i32
  }
}

</mosaic_0001>

<bundles_post_ra>
// kernel: autoencoder_forward.1
= control target key start
LH: loop header
LB: loop body
LE: loop exit
PB: predicated region body
PF: predicated region fallthrough
CT: control target
= control target key end

     0   :  { %8 = vsyncpa [#allocation3], 0  ;;  %s1879_s0 = inlined_call_operand.vmem [shape: f32[8,625], index: 0, kind: input, shape index: {}]   ;;  %s1880_s1 = inlined_call_operand.hbm [shape: f32[625,896], index: 1, kind: input, shape index: {}]   ;;  %s1881_s2 = inlined_call_operand.hbm [shape: f32[1,896], index: 2, kind: input, shape index: {}]   ;;  %s1882_s3 = inlined_call_operand.vmem [shape: f32[8,896], index: 3, kind: output, shape index: {}]  }
   0x1   :  { %9 = vsyncpa [#allocation5], 0  ;;  %s1708_s12 = smov [#allocation2]  }
   0x2   :  { %s17_s13 = sshll.u32 %s1708_s12, 4  ;;  %s18_s13 = int_to_ptr.vmem [resolvable:$true] %s17_s13 }
   0x3   :  { %s1672_s14 = scalar_lea.vmem %s18_s13, 70784  ;;  %p1677_p1 = scmp.lt.s32.totalorder %s18_s13, %s18_s13 }
   0x4   :  { %p1673_p0 = scmp.ne.s32.totalorder %s18_s13, %s1672_s14  ;;  %p1678_p2 = scmp.lt.s32.totalorder %s1672_s14, %s1672_s14 }
   0x6   :  { %p1679_p3 = por %p1678_p2, %p1677_p1 }
   0x8   :  { %p1680_p4 = pnand %p1679_p3, %p1673_p0 }
   0xa   :  { %1683 = shalt.err (!%p1680_p4)
}
   0xb   :  { %s1709_s15 = smov 896   ;;  %s1710_s16 = smov 56  }
   0xc   :  { %23 = dma.hbm_to_vmem [thread:$0]  %s1880_s1, 70784, %s18_s13, [#allocation3], %s1709_s15, %s1709_s15, %s1710_s16  }
   0xd   :  { %s1711_s19 = smov [#allocation4]  }
   0xe   :  { %s30_s20 = sshll.u32 %s1711_s19, 4  ;;  %s31_s20 = int_to_ptr.vmem [resolvable:$true] %s30_s20 }
   0xf   :  { %s1692_s21 = scalar_lea.vmem %s31_s20, 112  ;;  %s1696_s22 = scalar_lea.vmem %s31_s20, 128 }
  0x10   :  { %p1693_p5 = scmp.ne.s32.totalorder %s31_s20, %s1692_s21  ;;  %p1697_p6 = scmp.lt.s32.totalorder %s31_s20, %s31_s20 }
  0x11   :  { %p1698_p7 = scmp.lt.s32.totalorder %s1696_s22, %s1692_s21 }
  0x13   :  { %p1699_p8 = por %p1698_p7, %p1697_p6 }
  0x15   :  { %p1700_p9 = pnand %p1699_p8, %p1693_p5 }
  0x17   :  { %1703 = shalt.err (!%p1700_p9)
}
  0x18   :  { %33 = dma.hbm_to_vmem [thread:$0]  %s1881_s2, 112, %s31_s20, [#allocation5]  }
  0x19   :  { %1704 = dma.done.wait [#allocation3], 70784  }
  0x1a   :  { %1705 = vsyncadd [#allocation3], 4294896512 }
  0x1b   :  { %1706 = dma.done.wait [#allocation5], 112  }
  0x1c   :  { %1707 = vsyncadd [#allocation5], 4294967184  ;;  %v151_v0 = vld [vmem:[#allocation2 + $0x350] sm:$0xff]  ;;  %v150_v1 = vld [vmem:[#allocation2 + $0x348] sm:$0xff]  ;;  %vm639_vm0 = vcmask 1040384   ;;  %vm635_vm1 = vcmask 924672  }
  0x1d   :  { %v144_v2 = vld [vmem:[#allocation2 + $0x318] sm:$0xff]  ;;  %661 = vmatprep.subr.mxu0 %v151_v0  ;;  %v375_v3 = vld [vmem:[#allocation2 + $0xa50] sm:$0xff]  ;;  %v374_v5 = vld [vmem:[#allocation2 + $0xa48] sm:$0xff]  ;;  %vm1713_vm2 = vmmov 0  }
  0x1e   :  { %v143_v4 = vld [vmem:[#allocation2 + $0x310] sm:$0xff]  ;;  %662 = vmatpush1.msra.mxu0 %v150_v1  ;;  %732 = vmatprep.subr.mxu1 %v375_v3  ;;  %v137_v6 = vld [vmem:[#allocation2 + $0x2e0] sm:$0xff]  ;;  %v368_v7 = vld [vmem:[#allocation2 + $0xa18] sm:$0xff] }
  0x1f   :  { %663 = vmatprep.subr.mxu0 %v144_v2  ;;  %733 = vmatpush1.msra.mxu1 %v374_v5  ;;  %v136_v8 = vld [vmem:[#allocation2 + $0x2d8] sm:$0xff]  ;;  %v367_v9 = vld [vmem:[#allocation2 + $0xa10] sm:$0xff]  ;;  %v361_v10 = vld [vmem:[#allocation2 + $0x9e0] sm:$0xff] }
  0x20   :  { %664 = vmatpush1.msra.mxu0 %v143_v4  ;;  %734 = vmatprep.subr.mxu1 %v368_v7  ;;  %v130_v11 = vld [vmem:[#allocation2 + $0x2a8] sm:$0xff]  ;;  %v360_v12 = vld [vmem:[#allocation2 + $0x9d8] sm:$0xff]  ;;  %v129_v13 = vld [vmem:[#allocation2 + $0x2a0] sm:$0xff] }
  0x21   :  { %665 = vmatprep.subr.mxu0 %v137_v6  ;;  %735 = vmatpush1.msra.mxu1 %v367_v9  ;;  %v354_v14 = vld [vmem:[#allocation2 + $0x9a8] sm:$0xff]  ;;  %v123_v15 = vld [vmem:[#allocation2 + $0x270] sm:$0xff]  ;;  %v353_v16 = vld [vmem:[#allocation2 + $0x9a0] sm:$0xff] }
  0x22   :  { %666 = vmatpush1.msra.mxu0 %v136_v8  ;;  %736 = vmatprep.subr.mxu1 %v361_v10  ;;  %v122_v17 = vld [vmem:[#allocation2 + $0x268] sm:$0xff]  ;;  %v347_v18 = vld [vmem:[#allocation2 + $0x970] sm:$0xff]  ;;  %v116_v19 = vld [vmem:[#allocation2 + $0x238] sm:$0xff] }
  0x23   :  { %667 = vmatprep.subr.mxu0 %v130_v11  ;;  %737 = vmatpush1.msra.mxu1 %v360_v12  ;;  %v346_v20 = vld [vmem:[#allocation2 + $0x968] sm:$0xff]  ;;  %v115_v21 = vld [vmem:[#allocation2 + $0x230] sm:$0xff]  ;;  %v340_v22 = vld [vmem:[#allocation2 + $0x938] sm:$0xff] }
  0x24   :  { %668 = vmatpush1.msra.mxu0 %v129_v13  ;;  %738 = vmatprep.subr.mxu1 %v354_v14  ;;  %v109_v23 = vld [vmem:[#allocation2 + $0x200] sm:$0xff]  ;;  %v339_v24 = vld [vmem:[#allocation2 + $0x930] sm:$0xff]  ;;  %v108_v25 = vld [vmem:[#allocation2 + $0x1f8] sm:$0xff] }
  0x25   :  { %669 = vmatprep.subr.mxu0 %v123_v15  ;;  %739 = vmatpush1.msra.mxu1 %v353_v16  ;;  %v333_v26 = vld [vmem:[#allocation2 + $0x900] sm:$0xff]  ;;  %v102_v27 = vld [vmem:[#allocation2 + $0x1c8] sm:$0xff]  ;;  %v332_v28 = vld [vmem:[#allocation2 + $0x8f8] sm:$0xff] }
  0x26   :  { %670 = vmatpush1.msra.mxu0 %v122_v17  ;;  %740 = vmatprep.subr.mxu1 %v347_v18  ;;  %v101_v29 = vld [vmem:[#allocation2 + $0x1c0] sm:$0xff]  ;;  %v326_v30 = vld [vmem:[#allocation2 + $0x8c8] sm:$0xff]  ;;  %v95_v31 = vld [vmem:[#allocation2 + $0x190] sm:$0xff] }
  0x27   :  { %671 = vmatprep.subr.mxu0 %v116_v19  ;;  %741 = vmatpush1.msra.mxu1 %v346_v20  ;;  %v325_v32 = vld [vmem:[#allocation2 + $0x8c0] sm:$0xff]  ;;  %v94_v33 = vld [vmem:[#allocation2 + $0x188] sm:$0xff]  ;;  %v319_v34 = vld [vmem:[#allocation2 + $0x890] sm:$0xff] }
  0x28   :  { %672 = vmatpush1.msra.mxu0 %v115_v21  ;;  %742 = vmatprep.subr.mxu1 %v340_v22  ;;  %v88_v35 = vld [vmem:[#allocation2 + $0x158] sm:$0xff]  ;;  %v318_v36 = vld [vmem:[#allocation2 + $0x888] sm:$0xff]  ;;  %v87_v37 = vld [vmem:[#allocation2 + $0x150] sm:$0xff] }
  0x29   :  { %673 = vmatprep.subr.mxu0 %v109_v23  ;;  %743 = vmatpush1.msra.mxu1 %v339_v24  ;;  %v312_v38 = vld [vmem:[#allocation2 + $0x858] sm:$0xff]  ;;  %v81_v39 = vld [vmem:[#allocation2 + $0x120] sm:$0xff]  ;;  %v311_v40 = vld [vmem:[#allocation2 + $0x850] sm:$0xff] }
  0x2a   :  { %674 = vmatpush1.msra.mxu0 %v108_v25  ;;  %744 = vmatprep.subr.mxu1 %v333_v26  ;;  %v80_v41 = vld [vmem:[#allocation2 + $0x118] sm:$0xff]  ;;  %v305_v42 = vld [vmem:[#allocation2 + $0x820] sm:$0xff]  ;;  %v74_v43 = vld [vmem:[#allocation2 + $0xe8] sm:$0xff] }
  0x2b   :  { %675 = vmatprep.subr.mxu0 %v102_v27  ;;  %745 = vmatpush1.msra.mxu1 %v332_v28  ;;  %v304_v44 = vld [vmem:[#allocation2 + $0x818] sm:$0xff]  ;;  %v73_v45 = vld [vmem:[#allocation2 + $0xe0] sm:$0xff]  ;;  %v298_v46 = vld [vmem:[#allocation2 + $0x7e8] sm:$0xff] }
  0x2c   :  { %676 = vmatpush1.msra.mxu0 %v101_v29  ;;  %746 = vmatprep.subr.mxu1 %v326_v30  ;;  %v67_v47 = vld [vmem:[#allocation2 + $0xb0] sm:$0xff]  ;;  %v297_v48 = vld [vmem:[#allocation2 + $0x7e0] sm:$0xff]  ;;  %v66_v49 = vld [vmem:[#allocation2 + $0xa8] sm:$0xff] }
  0x2d   :  { %677 = vmatprep.subr.mxu0 %v95_v31  ;;  %747 = vmatpush1.msra.mxu1 %v325_v32  ;;  %v291_v50 = vld [vmem:[#allocation2 + $0x7b0] sm:$0xff]  ;;  %v60_v51 = vld [vmem:[#allocation2 + $0x78] sm:$0xff]  ;;  %v290_v52 = vld [vmem:[#allocation2 + $0x7a8] sm:$0xff] }
  0x2e   :  { %678 = vmatpush1.msra.mxu0 %v94_v33  ;;  %748 = vmatprep.subr.mxu1 %v319_v34  ;;  %v59_v53 = vld [vmem:[#allocation2 + $0x70] sm:$0xff]  ;;  %v284_v54 = vld [vmem:[#allocation2 + $0x778] sm:$0xff]  ;;  %v53_v55 = vld [vmem:[#allocation2 + $0x40] sm:$0xff] }
  0x2f   :  { %679 = vmatprep.subr.mxu0 %v88_v35  ;;  %749 = vmatpush1.msra.mxu1 %v318_v36  ;;  %v283_v56 = vld [vmem:[#allocation2 + $0x770] sm:$0xff]  ;;  %v52_v57 = vld [vmem:[#allocation2 + $0x38] sm:$0xff]  ;;  %v277_v58 = vld [vmem:[#allocation2 + $0x740] sm:$0xff] }
  0x30   :  { %680 = vmatpush1.msra.mxu0 %v87_v37  ;;  %750 = vmatprep.subr.mxu1 %v312_v38  ;;  %v46_v59 = vld [vmem:[#allocation2 + $0x8] sm:$0xff]  ;;  %v276_v60 = vld [vmem:[#allocation2 + $0x738] sm:$0xff]  ;;  %v45_v61 = vld [vmem:[#allocation2] sm:$0xff] }
  0x31   :  { %681 = vmatprep.subr.mxu0 %v81_v39  ;;  %751 = vmatpush1.msra.mxu1 %v311_v40  ;;  %v270_v62 = vld [vmem:[#allocation2 + $0x708] sm:$0xff]  ;;  %v263_v63 = vld [vmem:[#allocation2 + $0x6d0] sm:$0xff]  ;;  %v269_v0 = vld [vmem:[#allocation2 + $0x700] sm:$0xff] }
  0x32   :  { %682 = vmatpush1.msra.mxu0 %v80_v41  ;;  %752 = vmatprep.subr.mxu1 %v305_v42  ;;  %v262_v1 = vld [vmem:[#allocation2 + $0x6c8] sm:$0xff]  ;;  %v487_v2 = vld [vmem:[#allocation2 + $0xdd0] sm:$0xff]  ;;  %v256_v3 = vld [vmem:[#allocation2 + $0x698] sm:$0xff] }
  0x33   :  { %683 = vmatprep.subr.mxu0 %v74_v43  ;;  %753 = vmatpush1.msra.mxu1 %v304_v44  ;;  %v486_v4 = vld [vmem:[#allocation2 + $0xdc8] sm:$0xff]  ;;  %v255_v5 = vld [vmem:[#allocation2 + $0x690] sm:$0xff]  ;;  %v480_v6 = vld [vmem:[#allocation2 + $0xd98] sm:$0xff] }
  0x34   :  { %684 = vmatpush1.msra.mxu0 %v73_v45  ;;  %754 = vmatprep.subr.mxu1 %v298_v46  ;;  %v249_v7 = vld [vmem:[#allocation2 + $0x660] sm:$0xff]  ;;  %v479_v8 = vld [vmem:[#allocation2 + $0xd90] sm:$0xff]  ;;  %v248_v9 = vld [vmem:[#allocation2 + $0x658] sm:$0xff] }
  0x35   :  { %685 = vmatprep.subr.mxu0 %v67_v47  ;;  %755 = vmatpush1.msra.mxu1 %v297_v48  ;;  %v473_v10 = vld [vmem:[#allocation2 + $0xd60] sm:$0xff]  ;;  %v242_v11 = vld [vmem:[#allocation2 + $0x628] sm:$0xff]  ;;  %v472_v12 = vld [vmem:[#allocation2 + $0xd58] sm:$0xff] }
  0x36   :  { %686 = vmatpush1.msra.mxu0 %v66_v49  ;;  %756 = vmatprep.subr.mxu1 %v291_v50  ;;  %v241_v13 = vld [vmem:[#allocation2 + $0x620] sm:$0xff]  ;;  %v466_v14 = vld [vmem:[#allocation2 + $0xd28] sm:$0xff]  ;;  %v235_v15 = vld [vmem:[#allocation2 + $0x5f0] sm:$0xff] }
  0x37   :  { %687 = vmatprep.subr.mxu0 %v60_v51  ;;  %757 = vmatpush1.msra.mxu1 %v290_v52  ;;  %v465_v16 = vld [vmem:[#allocation2 + $0xd20] sm:$0xff]  ;;  %v234_v17 = vld [vmem:[#allocation2 + $0x5e8] sm:$0xff]  ;;  %v459_v18 = vld [vmem:[#allocation2 + $0xcf0] sm:$0xff] }
  0x38   :  { %688 = vmatpush1.msra.mxu0 %v59_v53  ;;  %758 = vmatprep.subr.mxu1 %v284_v54  ;;  %v228_v19 = vld [vmem:[#allocation2 + $0x5b8] sm:$0xff]  ;;  %v458_v20 = vld [vmem:[#allocation2 + $0xce8] sm:$0xff]  ;;  %v227_v21 = vld [vmem:[#allocation2 + $0x5b0] sm:$0xff] }
  0x39   :  { %689 = vmatprep.subr.mxu0 %v53_v55  ;;  %759 = vmatpush1.msra.mxu1 %v283_v56  ;;  %v452_v22 = vld [vmem:[#allocation2 + $0xcb8] sm:$0xff]  ;;  %v221_v23 = vld [vmem:[#allocation2 + $0x580] sm:$0xff]  ;;  %v451_v24 = vld [vmem:[#allocation2 + $0xcb0] sm:$0xff] }
  0x3a   :  { %690 = vmatpush1.msra.mxu0 %v52_v57  ;;  %760 = vmatprep.subr.mxu1 %v277_v58  ;;  %v220_v25 = vld [vmem:[#allocation2 + $0x578] sm:$0xff]  ;;  %v445_v26 = vld [vmem:[#allocation2 + $0xc80] sm:$0xff]  ;;  %v214_v27 = vld [vmem:[#allocation2 + $0x548] sm:$0xff] }
  0x3b   :  { %691 = vmatprep.subr.mxu0 %v46_v59  ;;  %761 = vmatpush1.msra.mxu1 %v276_v60  ;;  %v444_v28 = vld [vmem:[#allocation2 + $0xc78] sm:$0xff]  ;;  %v213_v29 = vld [vmem:[#allocation2 + $0x540] sm:$0xff]  ;;  %v438_v30 = vld [vmem:[#allocation2 + $0xc48] sm:$0xff] }
  0x3c   :  { %692 = vmatpush1.msra.mxu0 %v45_v61  ;;  %762 = vmatprep.subr.mxu1 %v270_v62  ;;  %v207_v31 = vld [vmem:[#allocation2 + $0x510] sm:$0xff]  ;;  %v437_v32 = vld [vmem:[#allocation2 + $0xc40] sm:$0xff]  ;;  %v206_v33 = vld [vmem:[#allocation2 + $0x508] sm:$0xff] }
  0x3d   :  { %693 = vmatprep.subr.mxu0 %v263_v63  ;;  %763 = vmatpush1.msra.mxu1 %v269_v0  ;;  %v431_v34 = vld [vmem:[#allocation2 + $0xc10] sm:$0xff]  ;;  %v200_v35 = vld [vmem:[#allocation2 + $0x4d8] sm:$0xff]  ;;  %v430_v36 = vld [vmem:[#allocation2 + $0xc08] sm:$0xff] }
  0x3e   :  { %694 = vmatpush2.msra.mxu0 %v262_v1  ;;  %764 = vmatprep.subr.mxu1 %v487_v2  ;;  %v199_v37 = vld [vmem:[#allocation2 + $0x4d0] sm:$0xff]  ;;  %v424_v38 = vld [vmem:[#allocation2 + $0xbd8] sm:$0xff]  ;;  %v193_v39 = vld [vmem:[#allocation2 + $0x4a0] sm:$0xff] }
  0x3f   :  { %695 = vmatprep.subr.mxu0 %v256_v3  ;;  %765 = vmatpush2.msra.mxu1 %v486_v4  ;;  %v423_v40 = vld [vmem:[#allocation2 + $0xbd0] sm:$0xff]  ;;  %v192_v41 = vld [vmem:[#allocation2 + $0x498] sm:$0xff]  ;;  %v417_v42 = vld [vmem:[#allocation2 + $0xba0] sm:$0xff] }
  0x40   :  { %696 = vmatpush2.msra.mxu0 %v255_v5  ;;  %766 = vmatprep.subr.mxu1 %v480_v6  ;;  %v186_v43 = vld [vmem:[#allocation2 + $0x468] sm:$0xff]  ;;  %v416_v44 = vld [vmem:[#allocation2 + $0xb98] sm:$0xff]  ;;  %v185_v45 = vld [vmem:[#allocation2 + $0x460] sm:$0xff] }
  0x41   :  { %697 = vmatprep.subr.mxu0 %v249_v7  ;;  %767 = vmatpush2.msra.mxu1 %v479_v8  ;;  %v410_v46 = vld [vmem:[#allocation2 + $0xb68] sm:$0xff]  ;;  %v179_v47 = vld [vmem:[#allocation2 + $0x430] sm:$0xff]  ;;  %v409_v48 = vld [vmem:[#allocation2 + $0xb60] sm:$0xff] }
  0x42   :  { %698 = vmatpush2.msra.mxu0 %v248_v9  ;;  %768 = vmatprep.subr.mxu1 %v473_v10  ;;  %v178_v49 = vld [vmem:[#allocation2 + $0x428] sm:$0xff]  ;;  %v403_v50 = vld [vmem:[#allocation2 + $0xb30] sm:$0xff]  ;;  %v172_v51 = vld [vmem:[#allocation2 + $0x3f8] sm:$0xff] }
  0x43   :  { %699 = vmatprep.subr.mxu0 %v242_v11  ;;  %769 = vmatpush2.msra.mxu1 %v472_v12  ;;  %v402_v52 = vld [vmem:[#allocation2 + $0xb28] sm:$0xff]  ;;  %v171_v53 = vld [vmem:[#allocation2 + $0x3f0] sm:$0xff]  ;;  %v396_v54 = vld [vmem:[#allocation2 + $0xaf8] sm:$0xff] }
  0x44   :  { %700 = vmatpush2.msra.mxu0 %v241_v13  ;;  %770 = vmatprep.subr.mxu1 %v466_v14  ;;  %v165_v55 = vld [vmem:[#allocation2 + $0x3c0] sm:$0xff]  ;;  %v395_v56 = vld [vmem:[#allocation2 + $0xaf0] sm:$0xff]  ;;  %v164_v57 = vld [vmem:[#allocation2 + $0x3b8] sm:$0xff] }
  0x45   :  { %701 = vmatprep.subr.mxu0 %v235_v15  ;;  %771 = vmatpush2.msra.mxu1 %v465_v16  ;;  %v389_v58 = vld [vmem:[#allocation2 + $0xac0] sm:$0xff]  ;;  %v158_v59 = vld [vmem:[#allocation2 + $0x388] sm:$0xff]  ;;  %v388_v62 = vld [vmem:[#allocation2 + $0xab8] sm:$0xff] }
  0x46   :  { %702 = vmatpush2.msra.mxu0 %v234_v17  ;;  %772 = vmatprep.subr.mxu1 %v459_v18  ;;  %v1743_v60 = vld [vmem:[%s1879_s0 + $0x8] sm:$0xff]  ;;  %v157_v61 = vld [vmem:[#allocation2 + $0x380] sm:$0xff]  ;;  %v592_v1 = vld [vmem:[#allocation2 + $0x1118] sm:$0x1] }
  0x47   :  { %703 = vmatprep.subr.mxu0 %v228_v19  ;;  %773 = vmatpush2.msra.mxu1 %v458_v20  ;;  %v1748_v63 = vld [vmem:[%s1879_s0] sm:$0xff]  ;;  %v382_v0 = vld [vmem:[#allocation2 + $0xa88] sm:$0xff]  ;;  %v1754_v3 = vld [vmem:[%s1879_s0 + $0x18] sm:$0xff] }
  0x48   :  { %704 = vmatpush2.msra.mxu0 %v227_v21  ;;  %774 = vmatprep.subr.mxu1 %v452_v22  ;;  %v381_v2 = vld [vmem:[#allocation2 + $0xa80] sm:$0xff]  ;;  %v591_v4 = vld [vmem:[#allocation2 + $0x1110] sm:$0x1]  ;;  %v584_v8 = vld [vmem:[#allocation2 + $0x10d8] sm:$0xff] }
  0x49   :  { %705 = vmatprep.subr.mxu0 %v221_v23  ;;  %775 = vmatpush2.msra.mxu1 %v451_v24  ;;  %v1760_v5 = vld [vmem:[%s1879_s0 + $0x10] sm:$0xff]  ;;  %v585_v6 = vld [vmem:[#allocation2 + $0x10e0] sm:$0xff]  ;;  %v152_v9 = vld [vmem:[#allocation2 + $0x358] sm:$0xff] }
  0x4a   :  { %706 = vmatpush2.msra.mxu0 %v220_v25  ;;  %776 = vmatprep.subr.mxu1 %v445_v26  ;;  %v153_v7 = vld [vmem:[#allocation2 + $0x360] sm:$0xff]  ;;  %v578_v10 = vld [vmem:[#allocation2 + $0x10a8] sm:$0xff]  ;;  %v571_v14 = vld [vmem:[#allocation2 + $0x1070] sm:$0xff] }
  0x4b   :  { %707 = vmatprep.subr.mxu0 %v214_v27  ;;  %777 = vmatpush2.msra.mxu1 %v444_v28  ;;  %v146_v11 = vld [vmem:[#allocation2 + $0x328] sm:$0xff]  ;;  %v577_v12 = vld [vmem:[#allocation2 + $0x10a0] sm:$0xff]  ;;  %v139_v15 = vld [vmem:[#allocation2 + $0x2f0] sm:$0xff] }
  0x4c   :  { %708 = vmatpush2.msra.mxu0 %v213_v29  ;;  %778 = vmatprep.subr.mxu1 %v438_v30  ;;  %v145_v13 = vld [vmem:[#allocation2 + $0x320] sm:$0xff]  ;;  %v570_v16 = vld [vmem:[#allocation2 + $0x1068] sm:$0xff]  ;;  %v564_v18 = vld [vmem:[#allocation2 + $0x1038] sm:$0xff] }
  0x4d   :  { %709 = vmatprep.subr.mxu0 %v207_v31  ;;  %779 = vmatpush2.msra.mxu1 %v437_v32  ;;  %v138_v17 = vld [vmem:[#allocation2 + $0x2e8] sm:$0xff]  ;;  %v132_v19 = vld [vmem:[#allocation2 + $0x2b8] sm:$0xff]  ;;  %v563_v20 = vld [vmem:[#allocation2 + $0x1030] sm:$0xff] }
  0x4e   :  { %710 = vmatpush2.msra.mxu0 %v206_v33  ;;  %780 = vmatprep.subr.mxu1 %v431_v34  ;;  %v131_v21 = vld [vmem:[#allocation2 + $0x2b0] sm:$0xff]  ;;  %v557_v22 = vld [vmem:[#allocation2 + $0x1000] sm:$0xff]  ;;  %v556_v24 = vld [vmem:[#allocation2 + $0xff8] sm:$0xff] }
  0x4f   :  { %711 = vmatprep.subr.mxu0 %v200_v35  ;;  %781 = vmatpush2.msra.mxu1 %v430_v36  ;;  %v125_v23 = vld [vmem:[#allocation2 + $0x280] sm:$0xff]  ;;  %v124_v25 = vld [vmem:[#allocation2 + $0x278] sm:$0xff]  ;;  %v550_v26 = vld [vmem:[#allocation2 + $0xfc8] sm:$0xff] }
  0x50   :  { %712 = vmatpush2.msra.mxu0 %v199_v37  ;;  %782 = vmatprep.subr.mxu1 %v424_v38  ;;  %v118_v27 = vld [vmem:[#allocation2 + $0x248] sm:$0xff]  ;;  %v549_v28 = vld [vmem:[#allocation2 + $0xfc0] sm:$0xff]  ;;  %v543_v30 = vld [vmem:[#allocation2 + $0xf90] sm:$0xff] }
  0x51   :  { %713 = vmatprep.subr.mxu0 %v193_v39  ;;  %783 = vmatpush2.msra.mxu1 %v423_v40  ;;  %v117_v29 = vld [vmem:[#allocation2 + $0x240] sm:$0xff]  ;;  %v111_v31 = vld [vmem:[#allocation2 + $0x210] sm:$0xff]  ;;  %v542_v32 = vld [vmem:[#allocation2 + $0xf88] sm:$0xff] }
  0x52   :  { %714 = vmatpush2.msra.mxu0 %v192_v41  ;;  %784 = vmatprep.subr.mxu1 %v417_v42  ;;  %v110_v33 = vld [vmem:[#allocation2 + $0x208] sm:$0xff]  ;;  %v536_v34 = vld [vmem:[#allocation2 + $0xf58] sm:$0xff]  ;;  %v535_v36 = vld [vmem:[#allocation2 + $0xf50] sm:$0xff] }
  0x53   :  { %715 = vmatprep.subr.mxu0 %v186_v43  ;;  %785 = vmatpush2.msra.mxu1 %v416_v44  ;;  %v104_v35 = vld [vmem:[#allocation2 + $0x1d8] sm:$0xff]  ;;  %v103_v37 = vld [vmem:[#allocation2 + $0x1d0] sm:$0xff]  ;;  %v529_v38 = vld [vmem:[#allocation2 + $0xf20] sm:$0xff] }
  0x54   :  { %716 = vmatpush2.msra.mxu0 %v185_v45  ;;  %786 = vmatprep.subr.mxu1 %v410_v46  ;;  %v97_v39 = vld [vmem:[#allocation2 + $0x1a0] sm:$0xff]  ;;  %v528_v40 = vld [vmem:[#allocation2 + $0xf18] sm:$0xff]  ;;  %v522_v42 = vld [vmem:[#allocation2 + $0xee8] sm:$0xff] }
  0x55   :  { %717 = vmatprep.subr.mxu0 %v179_v47  ;;  %787 = vmatpush2.msra.mxu1 %v409_v48  ;;  %v96_v41 = vld [vmem:[#allocation2 + $0x198] sm:$0xff]  ;;  %v90_v43 = vld [vmem:[#allocation2 + $0x168] sm:$0xff]  ;;  %v521_v44 = vld [vmem:[#allocation2 + $0xee0] sm:$0xff] }
  0x56   :  { %718 = vmatpush2.msra.mxu0 %v178_v49  ;;  %788 = vmatprep.subr.mxu1 %v403_v50  ;;  %v89_v45 = vld [vmem:[#allocation2 + $0x160] sm:$0xff]  ;;  %v515_v46 = vld [vmem:[#allocation2 + $0xeb0] sm:$0xff]  ;;  %v514_v48 = vld [vmem:[#allocation2 + $0xea8] sm:$0xff] }
  0x57   :  { %719 = vmatprep.subr.mxu0 %v172_v51  ;;  %789 = vmatpush2.msra.mxu1 %v402_v52  ;;  %v83_v47 = vld [vmem:[#allocation2 + $0x130] sm:$0xff]  ;;  %v82_v49 = vld [vmem:[#allocation2 + $0x128] sm:$0xff]  ;;  %v508_v50 = vld [vmem:[#allocation2 + $0xe78] sm:$0xff] }
  0x58   :  { %720 = vmatpush2.msra.mxu0 %v171_v53  ;;  %790 = vmatprep.subr.mxu1 %v396_v54  ;;  %v76_v51 = vld [vmem:[#allocation2 + $0xf8] sm:$0xff]  ;;  %v507_v52 = vld [vmem:[#allocation2 + $0xe70] sm:$0xff]  ;;  %v501_v54 = vld [vmem:[#allocation2 + $0xe40] sm:$0xff] }
  0x59   :  { %721 = vmatprep.subr.mxu0 %v165_v55  ;;  %791 = vmatpush2.msra.mxu1 %v395_v56  ;;  %v75_v53 = vld [vmem:[#allocation2 + $0xf0] sm:$0xff]  ;;  %v69_v55 = vld [vmem:[#allocation2 + $0xc0] sm:$0xff]  ;;  %v500_v56 = vld [vmem:[#allocation2 + $0xe38] sm:$0xff] }
  0x5a   :  { %722 = vmatpush2.msra.mxu0 %v164_v57  ;;  %792 = vmatprep.subr.mxu1 %v389_v58  ;;  %v68_v57 = vld [vmem:[#allocation2 + $0xb8] sm:$0xff]  ;;  %v494_v58 = vld [vmem:[#allocation2 + $0xe08] sm:$0xff] }
  0x5b   :  { %723 = vmatprep.subr.mxu0 %v158_v59  ;;  %725 = vmatprep.mubr.f32.mxu0 %v1743_v60  ;;  %v62_v59 = vld [vmem:[#allocation2 + $0x88] sm:$0xff] }
  0x5c   :  { %724 = vmatpush2.msra.mxu0 %v157_v61  ;;  %793 = vmatpush2.msra.mxu1 %v388_v62  ;;  %v493_v61 = vld [vmem:[#allocation2 + $0xe00] sm:$0xff] }
  0x5d   :  { %726 = vmatmul.mubr.f32.vlgmr.msra.gmra.mxu0 %v1748_v63  ;;  %794 = vmatprep.subr.mxu1 %v382_v0  ;;  %v61_v62 = vld [vmem:[#allocation2 + $0x80] sm:$0xff] }
  0x5e   :  { %1523 = vmatprep.subr.msk.mxu0 %vm639_vm0, %v592_v1  ;;  %795 = vmatpush2.msra.mxu1 %v381_v2  ;;  %v1769_v0 = vld [vmem:[%s1879_s0 + $0x20] sm:$0xff]  ;;  %v55_v1 = vld [vmem:[#allocation2 + $0x50] sm:$0xff] }
  0x5f   :  { %796 = vmatprep.mubr.f32.mxu1 %v1754_v3  ;;  %1524 = vmatpush1.msk.msra.mxu0 %vm639_vm0, %v591_v4  ;;  %v377_v2 = vld [vmem:[#allocation2 + $0xa60] sm:$0xff]  ;;  %v54_v4 = vld [vmem:[#allocation2 + $0x48] sm:$0xff] }
  0x60   :  { %797 = vmatmul.mubr.f32.vlgmr.msra.gmra.mxu1 %v1760_v5  ;;  %807 = vmatprep.subr.mxu0 %v585_v6  ;;  %v1712_v6 = vmov 0.0  }
  0x61   :  { %874 = vmatprep.subr.mxu1 %v153_v7  ;;  %808 = vmatpush1.msra.mxu0 %v584_v8  ;;  %v376_v7 = vld [vmem:[#allocation2 + $0xa58] sm:$0xff] }
  0x62   :  { %875 = vmatpush1.msra.mxu1 %v152_v9  ;;  %809 = vmatprep.subr.mxu0 %v578_v10  ;;  %v48_v8 = vld [vmem:[#allocation2 + $0x18] sm:$0xff]  ;;  %v370_v9 = vld [vmem:[#allocation2 + $0xa28] sm:$0xff]  ;;  %v47_v10 = vld [vmem:[#allocation2 + $0x10] sm:$0xff] }
  0x63   :  { %876 = vmatprep.subr.mxu1 %v146_v11  ;;  %810 = vmatpush1.msra.mxu0 %v577_v12  ;;  %v369_v11 = vld [vmem:[#allocation2 + $0xa20] sm:$0xff] }
  0x64   :  { %877 = vmatpush1.msra.mxu1 %v145_v13  ;;  %811 = vmatprep.subr.mxu0 %v571_v14  ;;  %v265_v12 = vld [vmem:[#allocation2 + $0x6e0] sm:$0xff]  ;;  %v363_v13 = vld [vmem:[#allocation2 + $0x9f0] sm:$0xff]  ;;  %v264_v14 = vld [vmem:[#allocation2 + $0x6d8] sm:$0xff] }
  0x65   :  { %878 = vmatprep.subr.mxu1 %v139_v15  ;;  %812 = vmatpush1.msra.mxu0 %v570_v16  ;;  %v362_v15 = vld [vmem:[#allocation2 + $0x9e8] sm:$0xff] }
  0x66   :  { %879 = vmatpush1.msra.mxu1 %v138_v17  ;;  %813 = vmatprep.subr.mxu0 %v564_v18  ;;  %v258_v16 = vld [vmem:[#allocation2 + $0x6a8] sm:$0xff]  ;;  %v356_v17 = vld [vmem:[#allocation2 + $0x9b8] sm:$0xff]  ;;  %v257_v18 = vld [vmem:[#allocation2 + $0x6a0] sm:$0xff] }
  0x67   :  { %880 = vmatprep.subr.mxu1 %v132_v19  ;;  %814 = vmatpush1.msra.mxu0 %v563_v20  ;;  %v355_v19 = vld [vmem:[#allocation2 + $0x9b0] sm:$0xff] }
  0x68   :  { %881 = vmatpush1.msra.mxu1 %v131_v21  ;;  %815 = vmatprep.subr.mxu0 %v557_v22  ;;  %v251_v20 = vld [vmem:[#allocation2 + $0x670] sm:$0xff]  ;;  %v349_v21 = vld [vmem:[#allocation2 + $0x980] sm:$0xff]  ;;  %v250_v22 = vld [vmem:[#allocation2 + $0x668] sm:$0xff] }
  0x69   :  { %882 = vmatprep.subr.mxu1 %v125_v23  ;;  %816 = vmatpush1.msra.mxu0 %v556_v24  ;;  %v348_v23 = vld [vmem:[#allocation2 + $0x978] sm:$0xff] }
  0x6a   :  { %883 = vmatpush1.msra.mxu1 %v124_v25  ;;  %817 = vmatprep.subr.mxu0 %v550_v26  ;;  %v244_v24 = vld [vmem:[#allocation2 + $0x638] sm:$0xff]  ;;  %v342_v25 = vld [vmem:[#allocation2 + $0x948] sm:$0xff]  ;;  %v243_v26 = vld [vmem:[#allocation2 + $0x630] sm:$0xff] }
  0x6b   :  { %884 = vmatprep.subr.mxu1 %v118_v27  ;;  %818 = vmatpush1.msra.mxu0 %v549_v28  ;;  %v341_v27 = vld [vmem:[#allocation2 + $0x940] sm:$0xff] }
  0x6c   :  { %885 = vmatpush1.msra.mxu1 %v117_v29  ;;  %819 = vmatprep.subr.mxu0 %v543_v30  ;;  %v237_v28 = vld [vmem:[#allocation2 + $0x600] sm:$0xff]  ;;  %v335_v29 = vld [vmem:[#allocation2 + $0x910] sm:$0xff]  ;;  %v236_v30 = vld [vmem:[#allocation2 + $0x5f8] sm:$0xff] }
  0x6d   :  { %886 = vmatprep.subr.mxu1 %v111_v31  ;;  %820 = vmatpush1.msra.mxu0 %v542_v32  ;;  %v334_v31 = vld [vmem:[#allocation2 + $0x908] sm:$0xff] }
  0x6e   :  { %887 = vmatpush1.msra.mxu1 %v110_v33  ;;  %821 = vmatprep.subr.mxu0 %v536_v34  ;;  %v230_v32 = vld [vmem:[#allocation2 + $0x5c8] sm:$0xff]  ;;  %v328_v33 = vld [vmem:[#allocation2 + $0x8d8] sm:$0xff]  ;;  %v229_v34 = vld [vmem:[#allocation2 + $0x5c0] sm:$0xff] }
  0x6f   :  { %888 = vmatprep.subr.mxu1 %v104_v35  ;;  %822 = vmatpush1.msra.mxu0 %v535_v36  ;;  %v327_v35 = vld [vmem:[#allocation2 + $0x8d0] sm:$0xff] }
  0x70   :  { %889 = vmatpush1.msra.mxu1 %v103_v37  ;;  %823 = vmatprep.subr.mxu0 %v529_v38  ;;  %v223_v36 = vld [vmem:[#allocation2 + $0x590] sm:$0xff]  ;;  %v321_v37 = vld [vmem:[#allocation2 + $0x8a0] sm:$0xff]  ;;  %v222_v38 = vld [vmem:[#allocation2 + $0x588] sm:$0xff] }
  0x71   :  { %890 = vmatprep.subr.mxu1 %v97_v39  ;;  %824 = vmatpush1.msra.mxu0 %v528_v40  ;;  %v320_v39 = vld [vmem:[#allocation2 + $0x898] sm:$0xff] }
  0x72   :  { %891 = vmatpush1.msra.mxu1 %v96_v41  ;;  %825 = vmatprep.subr.mxu0 %v522_v42  ;;  %v216_v40 = vld [vmem:[#allocation2 + $0x558] sm:$0xff]  ;;  %v314_v41 = vld [vmem:[#allocation2 + $0x868] sm:$0xff]  ;;  %v215_v42 = vld [vmem:[#allocation2 + $0x550] sm:$0xff] }
  0x73   :  { %892 = vmatprep.subr.mxu1 %v90_v43  ;;  %826 = vmatpush1.msra.mxu0 %v521_v44  ;;  %v313_v43 = vld [vmem:[#allocation2 + $0x860] sm:$0xff] }
  0x74   :  { %893 = vmatpush1.msra.mxu1 %v89_v45  ;;  %827 = vmatprep.subr.mxu0 %v515_v46  ;;  %v209_v44 = vld [vmem:[#allocation2 + $0x520] sm:$0xff]  ;;  %v307_v45 = vld [vmem:[#allocation2 + $0x830] sm:$0xff]  ;;  %v208_v46 = vld [vmem:[#allocation2 + $0x518] sm:$0xff] }
  0x75   :  { %894 = vmatprep.subr.mxu1 %v83_v47  ;;  %828 = vmatpush1.msra.mxu0 %v514_v48  ;;  %v306_v47 = vld [vmem:[#allocation2 + $0x828] sm:$0xff] }
  0x76   :  { %895 = vmatpush1.msra.mxu1 %v82_v49  ;;  %829 = vmatprep.subr.mxu0 %v508_v50  ;;  %v202_v48 = vld [vmem:[#allocation2 + $0x4e8] sm:$0xff]  ;;  %v300_v49 = vld [vmem:[#allocation2 + $0x7f8] sm:$0xff]  ;;  %v201_v50 = vld [vmem:[#allocation2 + $0x4e0] sm:$0xff] }
  0x77   :  { %896 = vmatprep.subr.mxu1 %v76_v51  ;;  %830 = vmatpush1.msra.mxu0 %v507_v52  ;;  %v299_v51 = vld [vmem:[#allocation2 + $0x7f0] sm:$0xff] }
  0x78   :  { %897 = vmatpush1.msra.mxu1 %v75_v53  ;;  %831 = vmatprep.subr.mxu0 %v501_v54  ;;  %v195_v52 = vld [vmem:[#allocation2 + $0x4b0] sm:$0xff]  ;;  %v293_v53 = vld [vmem:[#allocation2 + $0x7c0] sm:$0xff]  ;;  %v194_v54 = vld [vmem:[#allocation2 + $0x4a8] sm:$0xff] }
  0x79   :  { %898 = vmatprep.subr.mxu1 %v69_v55  ;;  %832 = vmatpush1.msra.mxu0 %v500_v56  ;;  %v292_v55 = vld [vmem:[#allocation2 + $0x7b8] sm:$0xff] }
  0x7a   :  { %899 = vmatpush1.msra.mxu1 %v68_v57  ;;  %833 = vmatprep.subr.mxu0 %v494_v58  ;;  %v188_v56 = vld [vmem:[#allocation2 + $0x478] sm:$0xff]  ;;  %v286_v57 = vld [vmem:[#allocation2 + $0x788] sm:$0xff]  ;;  %v187_v58 = vld [vmem:[#allocation2 + $0x470] sm:$0xff] }
  0x7b   :  { %900 = vmatprep.subr.mxu1 %v62_v59  ;;  %834 = vmatpush1.msra.mxu0 %v493_v61  ;;  %v285_v59 = vld [vmem:[#allocation2 + $0x780] sm:$0xff] }
  0x7c   :  { %867 = vmatprep.mubr.f32.mxu0 %v1712_v6  ;;  %901 = vmatpush1.msra.mxu1 %v61_v62  ;;  %v181_v61 = vld [vmem:[#allocation2 + $0x440] sm:$0xff]  ;;  %v279_v62 = vld [vmem:[#allocation2 + $0x750] sm:$0xff] }
  0x7d   :  { %1525 = vmatmul.mubr.msk.f32.vlgmr.msra.gmra.mxu0 %vm635_vm1, %v1769_v0  ;;  %902 = vmatprep.subr.mxu1 %v55_v1  ;;  %v180_v1 = vld [vmem:[#allocation2 + $0x438] sm:$0xff] }
  0x7e   :  { %945 = vmatprep.subr.mxu0 %v377_v2  ;;  %903 = vmatpush1.msra.mxu1 %v54_v4  ;;  %v278_v2 = vld [vmem:[#allocation2 + $0x748] sm:$0xff] }
  0x7f   :  { %946 = vmatpush1.msra.mxu0 %v376_v7  ;;  %904 = vmatprep.subr.mxu1 %v48_v8  ;;  %v174_v4 = vld [vmem:[#allocation2 + $0x408] sm:$0xff]  ;;  %v272_v7 = vld [vmem:[#allocation2 + $0x718] sm:$0xff]  ;;  %v173_v8 = vld [vmem:[#allocation2 + $0x400] sm:$0xff] }
  0x80   :  { %947 = vmatprep.subr.mxu0 %v370_v9  ;;  %905 = vmatpush1.msra.mxu1 %v47_v10  ;;  %v271_v9 = vld [vmem:[#allocation2 + $0x710] sm:$0xff] }
  0x81   :  { %948 = vmatpush1.msra.mxu0 %v369_v11  ;;  %906 = vmatprep.subr.mxu1 %v265_v12  ;;  %v167_v10 = vld [vmem:[#allocation2 + $0x3d0] sm:$0xff]  ;;  %v489_v11 = vld [vmem:[#allocation2 + $0xde0] sm:$0xff]  ;;  %v166_v12 = vld [vmem:[#allocation2 + $0x3c8] sm:$0xff] }
  0x82   :  { %949 = vmatprep.subr.mxu0 %v363_v13  ;;  %907 = vmatpush2.msra.mxu1 %v264_v14  ;;  %v488_v13 = vld [vmem:[#allocation2 + $0xdd8] sm:$0xff] }
  0x83   :  { %950 = vmatpush1.msra.mxu0 %v362_v15  ;;  %908 = vmatprep.subr.mxu1 %v258_v16  ;;  %v160_v14 = vld [vmem:[#allocation2 + $0x398] sm:$0xff]  ;;  %v482_v15 = vld [vmem:[#allocation2 + $0xda8] sm:$0xff]  ;;  %v159_v16 = vld [vmem:[#allocation2 + $0x390] sm:$0xff] }
  0x84   :  { %951 = vmatprep.subr.mxu0 %v356_v17  ;;  %909 = vmatpush2.msra.mxu1 %v257_v18  ;;  %v481_v17 = vld [vmem:[#allocation2 + $0xda0] sm:$0xff]  ;;  %v475_v18 = vld [vmem:[#allocation2 + $0xd70] sm:$0xff] }
  0x85   :  { %952 = vmatpush1.msra.mxu0 %v355_v19  ;;  %910 = vmatprep.subr.mxu1 %v251_v20  ;;  %v594_v19 = vld [vmem:[#allocation2 + $0x1128] sm:$0x1] }
  0x86   :  { %953 = vmatprep.subr.mxu0 %v349_v21  ;;  %911 = vmatpush2.msra.mxu1 %v250_v22  ;;  %v474_v20 = vld [vmem:[#allocation2 + $0xd68] sm:$0xff]  ;;  %v593_v21 = vld [vmem:[#allocation2 + $0x1120] sm:$0x1]  ;;  %v468_v22 = vld [vmem:[#allocation2 + $0xd38] sm:$0xff] }
  0x87   :  { %954 = vmatpush1.msra.mxu0 %v348_v23  ;;  %912 = vmatprep.subr.mxu1 %v244_v24  ;;  %v587_v23 = vld [vmem:[#allocation2 + $0x10f0] sm:$0xff] }
  0x88   :  { %955 = vmatprep.subr.mxu0 %v342_v25  ;;  %913 = vmatpush2.msra.mxu1 %v243_v26  ;;  %v467_v24 = vld [vmem:[#allocation2 + $0xd30] sm:$0xff]  ;;  %v586_v25 = vld [vmem:[#allocation2 + $0x10e8] sm:$0xff]  ;;  %v461_v26 = vld [vmem:[#allocation2 + $0xd00] sm:$0xff] }
  0x89   :  { %956 = vmatpush1.msra.mxu0 %v341_v27  ;;  %914 = vmatprep.subr.mxu1 %v237_v28  ;;  %v580_v27 = vld [vmem:[#allocation2 + $0x10b8] sm:$0xff] }
  0x8a   :  { %957 = vmatprep.subr.mxu0 %v335_v29  ;;  %915 = vmatpush2.msra.mxu1 %v236_v30  ;;  %v460_v28 = vld [vmem:[#allocation2 + $0xcf8] sm:$0xff]  ;;  %v454_v29 = vld [vmem:[#allocation2 + $0xcc8] sm:$0xff]  ;;  %v573_v30 = vld [vmem:[#allocation2 + $0x1080] sm:$0xff] }
  0x8b   :  { %958 = vmatpush1.msra.mxu0 %v334_v31  ;;  %916 = vmatprep.subr.mxu1 %v230_v32  ;;  %v453_v31 = vld [vmem:[#allocation2 + $0xcc0] sm:$0xff]  ;;  %v572_v32 = vld [vmem:[#allocation2 + $0x1078] sm:$0xff] }
  0x8c   :  { %959 = vmatprep.subr.mxu0 %v328_v33  ;;  %917 = vmatpush2.msra.mxu1 %v229_v34  ;;  %v566_v33 = vld [vmem:[#allocation2 + $0x1048] sm:$0xff] }
  0x8d   :  { %960 = vmatpush1.msra.mxu0 %v327_v35  ;;  %918 = vmatprep.subr.mxu1 %v223_v36  ;;  %v446_v34 = vld [vmem:[#allocation2 + $0xc88] sm:$0xff]  ;;  %v565_v35 = vld [vmem:[#allocation2 + $0x1040] sm:$0xff]  ;;  %v440_v36 = vld [vmem:[#allocation2 + $0xc58] sm:$0xff] }
  0x8e   :  { %961 = vmatprep.subr.mxu0 %v321_v37  ;;  %919 = vmatpush2.msra.mxu1 %v222_v38  ;;  %v559_v37 = vld [vmem:[#allocation2 + $0x1010] sm:$0xff] }
  0x8f   :  { %962 = vmatpush1.msra.mxu0 %v320_v39  ;;  %920 = vmatprep.subr.mxu1 %v216_v40  ;;  %v439_v38 = vld [vmem:[#allocation2 + $0xc50] sm:$0xff]  ;;  %v558_v39 = vld [vmem:[#allocation2 + $0x1008] sm:$0xff]  ;;  %v433_v40 = vld [vmem:[#allocation2 + $0xc20] sm:$0xff] }
  0x90   :  { %963 = vmatprep.subr.mxu0 %v314_v41  ;;  %921 = vmatpush2.msra.mxu1 %v215_v42  ;;  %v552_v41 = vld [vmem:[#allocation2 + $0xfd8] sm:$0xff] }
  0x91   :  { %964 = vmatpush1.msra.mxu0 %v313_v43  ;;  %922 = vmatprep.subr.mxu1 %v209_v44  ;;  %v432_v42 = vld [vmem:[#allocation2 + $0xc18] sm:$0xff]  ;;  %v551_v43 = vld [vmem:[#allocation2 + $0xfd0] sm:$0xff]  ;;  %v426_v44 = vld [vmem:[#allocation2 + $0xbe8] sm:$0xff] }
  0x92   :  { %965 = vmatprep.subr.mxu0 %v307_v45  ;;  %923 = vmatpush2.msra.mxu1 %v208_v46  ;;  %v545_v45 = vld [vmem:[#allocation2 + $0xfa0] sm:$0xff] }
  0x93   :  { %966 = vmatpush1.msra.mxu0 %v306_v47  ;;  %924 = vmatprep.subr.mxu1 %v202_v48  ;;  %v425_v46 = vld [vmem:[#allocation2 + $0xbe0] sm:$0xff]  ;;  %v544_v47 = vld [vmem:[#allocation2 + $0xf98] sm:$0xff]  ;;  %v419_v48 = vld [vmem:[#allocation2 + $0xbb0] sm:$0xff] }
  0x94   :  { %967 = vmatprep.subr.mxu0 %v300_v49  ;;  %925 = vmatpush2.msra.mxu1 %v201_v50  ;;  %v538_v49 = vld [vmem:[#allocation2 + $0xf68] sm:$0xff] }
  0x95   :  { %968 = vmatpush1.msra.mxu0 %v299_v51  ;;  %926 = vmatprep.subr.mxu1 %v195_v52  ;;  %v418_v50 = vld [vmem:[#allocation2 + $0xba8] sm:$0xff]  ;;  %v537_v51 = vld [vmem:[#allocation2 + $0xf60] sm:$0xff]  ;;  %v412_v52 = vld [vmem:[#allocation2 + $0xb78] sm:$0xff] }
  0x96   :  { %969 = vmatprep.subr.mxu0 %v293_v53  ;;  %927 = vmatpush2.msra.mxu1 %v194_v54  ;;  %v531_v53 = vld [vmem:[#allocation2 + $0xf30] sm:$0xff] }
  0x97   :  { %970 = vmatpush1.msra.mxu0 %v292_v55  ;;  %928 = vmatprep.subr.mxu1 %v188_v56  ;;  %v411_v54 = vld [vmem:[#allocation2 + $0xb70] sm:$0xff]  ;;  %v530_v55 = vld [vmem:[#allocation2 + $0xf28] sm:$0xff]  ;;  %v405_v56 = vld [vmem:[#allocation2 + $0xb40] sm:$0xff] }
  0x98   :  { %971 = vmatprep.subr.mxu0 %v286_v57  ;;  %929 = vmatpush2.msra.mxu1 %v187_v58  ;;  %v524_v57 = vld [vmem:[#allocation2 + $0xef8] sm:$0xff] }
  0x99   :  { %972 = vmatpush1.msra.mxu0 %v285_v59  ;;  %930 = vmatprep.subr.mxu1 %v181_v61  ;;  %v404_v58 = vld [vmem:[#allocation2 + $0xb38] sm:$0xff]  ;;  %v523_v59 = vld [vmem:[#allocation2 + $0xef0] sm:$0xff]  ;;  %v398_v61 = vld [vmem:[#allocation2 + $0xb08] sm:$0xff] }
  0x9a   :  { %973 = vmatprep.subr.mxu0 %v279_v62  ;;  %931 = vmatpush2.msra.mxu1 %v180_v1  ;;  %v517_v62 = vld [vmem:[#allocation2 + $0xec0] sm:$0xff] }
  0x9b   :  { %974 = vmatpush1.msra.mxu0 %v278_v2  ;;  %932 = vmatprep.subr.mxu1 %v174_v4  ;;  %v397_v1 = vld [vmem:[#allocation2 + $0xb00] sm:$0xff]  ;;  %v516_v2 = vld [vmem:[#allocation2 + $0xeb8] sm:$0xff]  ;;  %v391_v4 = vld [vmem:[#allocation2 + $0xad0] sm:$0xff] }
  0x9c   :  { %975 = vmatprep.subr.mxu0 %v272_v7  ;;  %933 = vmatpush2.msra.mxu1 %v173_v8  ;;  %v510_v7 = vld [vmem:[#allocation2 + $0xe88] sm:$0xff] }
  0x9d   :  { %976 = vmatpush1.msra.mxu0 %v271_v9  ;;  %934 = vmatprep.subr.mxu1 %v167_v10  ;;  %v390_v8 = vld [vmem:[#allocation2 + $0xac8] sm:$0xff]  ;;  %v509_v9 = vld [vmem:[#allocation2 + $0xe80] sm:$0xff]  ;;  %v384_v10 = vld [vmem:[#allocation2 + $0xa98] sm:$0xff] }
  0x9e   :  { %977 = vmatprep.subr.mxu0 %v489_v11  ;;  %935 = vmatpush2.msra.mxu1 %v166_v12  ;;  %v503_v11 = vld [vmem:[#allocation2 + $0xe50] sm:$0xff] }
  0x9f   :  { %978 = vmatpush2.msra.mxu0 %v488_v13  ;;  %936 = vmatprep.subr.mxu1 %v160_v14  ;;  %v383_v12 = vld [vmem:[#allocation2 + $0xa90] sm:$0xff]  ;;  %v502_v13 = vld [vmem:[#allocation2 + $0xe48] sm:$0xff]  ;;  %v496_v14 = vld [vmem:[#allocation2 + $0xe18] sm:$0xff] }
  0xa0   :  { %979 = vmatprep.subr.mxu0 %v482_v15  ;;  %937 = vmatpush2.msra.mxu1 %v159_v16  ;;  %v155_v15 = vld [vmem:[#allocation2 + $0x370] sm:$0xff] }
  0xa1   :  { %980 = vmatpush2.msra.mxu0 %v481_v17  ;;  %938 = vmatprep.mubr.f32.mxu1 %v1743_v60  ;;  %v579_v60 = vld [vmem:[#allocation2 + $0x10b0] sm:$0xff]  ;;  %v154_v17 = vld [vmem:[#allocation2 + $0x368] sm:$0xff] }
  0xa2   :  { %981 = vmatprep.subr.mxu0 %v475_v18  ;;  %1526 = vmatprep.subr.msk.mxu1 %vm639_vm0, %v594_v19  ;;  %v495_v16 = vld [vmem:[#allocation2 + $0xe10] sm:$0xff]  ;;  %v148_v18 = vld [vmem:[#allocation2 + $0x338] sm:$0xff] }
  0xa3   :  { %939 = vmatmul.mubr.f32.vlgmr.msra.gmra.mxu1 %v1748_v63  ;;  %982 = vmatpush2.msra.mxu0 %v474_v20  ;;  %v447_v63 = vld [vmem:[#allocation2 + $0xc90] sm:$0xff] }
  0xa4   :  { %1527 = vmatpush1.msk.msra.mxu1 %vm639_vm0, %v593_v21  ;;  %983 = vmatprep.subr.mxu0 %v468_v22  ;;  %v379_v19 = vld [vmem:[#allocation2 + $0xa70] sm:$0xff]  ;;  %v378_v21 = vld [vmem:[#allocation2 + $0xa68] sm:$0xff]  ;;  %v141_v22 = vld [vmem:[#allocation2 + $0x300] sm:$0xff] }
  0xa5   :  { %1020 = vmatprep.subr.mxu1 %v587_v23  ;;  %984 = vmatpush2.msra.mxu0 %v467_v24  ;;  %v147_v20 = vld [vmem:[#allocation2 + $0x330] sm:$0xff]  ;;  %v140_v23 = vld [vmem:[#allocation2 + $0x2f8] sm:$0xff]  ;;  %v134_v24 = vld [vmem:[#allocation2 + $0x2c8] sm:$0xff] }
  0xa6   :  { %1021 = vmatpush1.msra.mxu1 %v586_v25  ;;  %985 = vmatprep.subr.mxu0 %v461_v26  ;;  %v365_v25 = vld [vmem:[#allocation2 + $0xa00] sm:$0xff] }
  0xa7   :  { %1022 = vmatprep.subr.mxu1 %v580_v27  ;;  %986 = vmatpush2.msra.mxu0 %v460_v28  ;;  %v133_v26 = vld [vmem:[#allocation2 + $0x2c0] sm:$0xff]  ;;  %v364_v27 = vld [vmem:[#allocation2 + $0x9f8] sm:$0xff]  ;;  %v127_v28 = vld [vmem:[#allocation2 + $0x290] sm:$0xff] }
  0xa8   :  { %1023 = vmatpush1.msra.mxu1 %v579_v60  ;;  %987 = vmatprep.subr.mxu0 %v454_v29  ;;  %v358_v60 = vld [vmem:[#allocation2 + $0x9c8] sm:$0xff] }
  0xa9   :  { %1024 = vmatprep.subr.mxu1 %v573_v30  ;;  %988 = vmatpush2.msra.mxu0 %v453_v31  ;;  %v126_v29 = vld [vmem:[#allocation2 + $0x288] sm:$0xff]  ;;  %v120_v30 = vld [vmem:[#allocation2 + $0x258] sm:$0xff]  ;;  %v351_v31 = vld [vmem:[#allocation2 + $0x990] sm:$0xff] }
  0xaa   :  { %1025 = vmatpush1.msra.mxu1 %v572_v32  ;;  %989 = vmatprep.subr.mxu0 %v447_v63  ;;  %v119_v32 = vld [vmem:[#allocation2 + $0x250] sm:$0xff]  ;;  %v350_v63 = vld [vmem:[#allocation2 + $0x988] sm:$0xff] }
  0xab   :  { %1026 = vmatprep.subr.mxu1 %v566_v33  ;;  %990 = vmatpush2.msra.mxu0 %v446_v34  ;;  %v113_v33 = vld [vmem:[#allocation2 + $0x220] sm:$0xff]  ;;  %v344_v34 = vld [vmem:[#allocation2 + $0x958] sm:$0xff] }
  0xac   :  { %1027 = vmatpush1.msra.mxu1 %v565_v35  ;;  %991 = vmatprep.subr.mxu0 %v440_v36  ;;  %v112_v35 = vld [vmem:[#allocation2 + $0x218] sm:$0xff]  ;;  %v343_v36 = vld [vmem:[#allocation2 + $0x950] sm:$0xff] }
  0xad   :  { %1028 = vmatprep.subr.mxu1 %v559_v37  ;;  %992 = vmatpush2.msra.mxu0 %v439_v38  ;;  %v106_v37 = vld [vmem:[#allocation2 + $0x1e8] sm:$0xff]  ;;  %v337_v38 = vld [vmem:[#allocation2 + $0x920] sm:$0xff] }
  0xae   :  { %1029 = vmatpush1.msra.mxu1 %v558_v39  ;;  %993 = vmatprep.subr.mxu0 %v433_v40  ;;  %v105_v39 = vld [vmem:[#allocation2 + $0x1e0] sm:$0xff]  ;;  %v336_v40 = vld [vmem:[#allocation2 + $0x918] sm:$0xff] }
  0xaf   :  { %1030 = vmatprep.subr.mxu1 %v552_v41  ;;  %994 = vmatpush2.msra.mxu0 %v432_v42  ;;  %v99_v41 = vld [vmem:[#allocation2 + $0x1b0] sm:$0xff]  ;;  %v330_v42 = vld [vmem:[#allocation2 + $0x8e8] sm:$0xff] }
  0xb0   :  { %1031 = vmatpush1.msra.mxu1 %v551_v43  ;;  %995 = vmatprep.subr.mxu0 %v426_v44  ;;  %v98_v43 = vld [vmem:[#allocation2 + $0x1a8] sm:$0xff]  ;;  %v329_v44 = vld [vmem:[#allocation2 + $0x8e0] sm:$0xff] }
  0xb1   :  { %1032 = vmatprep.subr.mxu1 %v545_v45  ;;  %996 = vmatpush2.msra.mxu0 %v425_v46  ;;  %v92_v45 = vld [vmem:[#allocation2 + $0x178] sm:$0xff]  ;;  %v323_v46 = vld [vmem:[#allocation2 + $0x8b0] sm:$0xff] }
  0xb2   :  { %1033 = vmatpush1.msra.mxu1 %v544_v47  ;;  %997 = vmatprep.subr.mxu0 %v419_v48  ;;  %v91_v47 = vld [vmem:[#allocation2 + $0x170] sm:$0xff]  ;;  %v322_v48 = vld [vmem:[#allocation2 + $0x8a8] sm:$0xff] }
  0xb3   :  { %1034 = vmatprep.subr.mxu1 %v538_v49  ;;  %998 = vmatpush2.msra.mxu0 %v418_v50  ;;  %v85_v49 = vld [vmem:[#allocation2 + $0x140] sm:$0xff]  ;;  %v316_v50 = vld [vmem:[#allocation2 + $0x878] sm:$0xff] }
  0xb4   :  { %1035 = vmatpush1.msra.mxu1 %v537_v51  ;;  %999 = vmatprep.subr.mxu0 %v412_v52  ;;  %v84_v51 = vld [vmem:[#allocation2 + $0x138] sm:$0xff]  ;;  %v315_v52 = vld [vmem:[#allocation2 + $0x870] sm:$0xff] }
  0xb5   :  { %1036 = vmatprep.subr.mxu1 %v531_v53  ;;  %1000 = vmatpush2.msra.mxu0 %v411_v54  ;;  %v78_v53 = vld [vmem:[#allocation2 + $0x108] sm:$0xff]  ;;  %v309_v54 = vld [vmem:[#allocation2 + $0x840] sm:$0xff] }
  0xb6   :  { %1037 = vmatpush1.msra.mxu1 %v530_v55  ;;  %1001 = vmatprep.subr.mxu0 %v405_v56  ;;  %v77_v55 = vld [vmem:[#allocation2 + $0x100] sm:$0xff]  ;;  %v308_v56 = vld [vmem:[#allocation2 + $0x838] sm:$0xff] }
  0xb7   :  { %1038 = vmatprep.subr.mxu1 %v524_v57  ;;  %1002 = vmatpush2.msra.mxu0 %v404_v58  ;;  %v71_v57 = vld [vmem:[#allocation2 + $0xd0] sm:$0xff]  ;;  %v302_v58 = vld [vmem:[#allocation2 + $0x808] sm:$0xff] }
  0xb8   :  { %1039 = vmatpush1.msra.mxu1 %v523_v59  ;;  %1003 = vmatprep.subr.mxu0 %v398_v61  ;;  %v70_v59 = vld [vmem:[#allocation2 + $0xc8] sm:$0xff]  ;;  %v301_v61 = vld [vmem:[#allocation2 + $0x800] sm:$0xff] }
  0xb9   :  { %1040 = vmatprep.subr.mxu1 %v517_v62  ;;  %1004 = vmatpush2.msra.mxu0 %v397_v1  ;;  %v64_v62 = vld [vmem:[#allocation2 + $0x98] sm:$0xff]  ;;  %v295_v1 = vld [vmem:[#allocation2 + $0x7d0] sm:$0xff] }
  0xba   :  { %1041 = vmatpush1.msra.mxu1 %v516_v2  ;;  %1005 = vmatprep.subr.mxu0 %v391_v4  ;;  %v63_v2 = vld [vmem:[#allocation2 + $0x90] sm:$0xff]  ;;  %v294_v4 = vld [vmem:[#allocation2 + $0x7c8] sm:$0xff] }
  0xbb   :  { %1042 = vmatprep.subr.mxu1 %v510_v7  ;;  %1006 = vmatpush2.msra.mxu0 %v390_v8  ;;  %v57_v7 = vld [vmem:[#allocation2 + $0x60] sm:$0xff]  ;;  %v288_v8 = vld [vmem:[#allocation2 + $0x798] sm:$0xff] }
  0xbc   :  { %1043 = vmatpush1.msra.mxu1 %v509_v9  ;;  %1007 = vmatprep.subr.mxu0 %v384_v10  ;;  %v56_v9 = vld [vmem:[#allocation2 + $0x58] sm:$0xff]  ;;  %v287_v10 = vld [vmem:[#allocation2 + $0x790] sm:$0xff] }
  0xbd   :  { %1044 = vmatprep.subr.mxu1 %v503_v11  ;;  %1008 = vmatpush2.msra.mxu0 %v383_v12  ;;  %v50_v11 = vld [vmem:[#allocation2 + $0x28] sm:$0xff]  ;;  %v281_v12 = vld [vmem:[#allocation2 + $0x760] sm:$0xff] }
  0xbe   :  { %1009 = vmatprep.mubr.f32.mxu0 %v1754_v3  ;;  %1045 = vmatpush1.msra.mxu1 %v502_v13  ;;  %v372_v3 = vld [vmem:[#allocation2 + $0xa38] sm:$0xff]  ;;  %v49_v13 = vld [vmem:[#allocation2 + $0x20] sm:$0xff] }
  0xbf   :  { %1010 = vmatmul.mubr.f32.vlgmr.msra.gmra.mxu0 %v1760_v5  ;;  %1046 = vmatprep.subr.mxu1 %v496_v14  ;;  %v371_v5 = vld [vmem:[#allocation2 + $0xa30] sm:$0xff]  ;;  %v280_v14 = vld [vmem:[#allocation2 + $0x758] sm:$0xff] }
  0xc0   :  { %1087 = vmatprep.subr.mxu0 %v155_v15  ;;  %1047 = vmatpush1.msra.mxu1 %v495_v16  ;;  %v267_v15 = vld [vmem:[#allocation2 + $0x6f0] sm:$0xff]  ;;  %v274_v16 = vld [vmem:[#allocation2 + $0x728] sm:$0xff] }
  0xc1   :  { %1080 = vmatprep.mubr.f32.mxu1 %v1712_v6  ;;  %1088 = vmatpush1.msra.mxu0 %v154_v17  ;;  %v266_v17 = vld [vmem:[#allocation2 + $0x6e8] sm:$0xff] }
  0xc2   :  { %1528 = vmatmul.mubr.msk.f32.vlgmr.msra.gmra.mxu1 %vm635_vm1, %v1769_v0  ;;  %1089 = vmatprep.subr.mxu0 %v148_v18  ;;  %v357_v0 = vld [vmem:[#allocation2 + $0x9c0] sm:$0xff] }
  0xc3   :  { %1158 = vmatprep.subr.mxu1 %v379_v19  ;;  %1090 = vmatpush1.msra.mxu0 %v147_v20  ;;  %v273_v18 = vld [vmem:[#allocation2 + $0x720] sm:$0xff]  ;;  %v260_v19 = vld [vmem:[#allocation2 + $0x6b8] sm:$0xff]  ;;  %v491_v20 = vld [vmem:[#allocation2 + $0xdf0] sm:$0xff] }
  0xc4   :  { %1159 = vmatpush1.msra.mxu1 %v378_v21  ;;  %1091 = vmatprep.subr.mxu0 %v141_v22  ;;  %v259_v21 = vld [vmem:[#allocation2 + $0x6b0] sm:$0xff]  ;;  %v490_v22 = vld [vmem:[#allocation2 + $0xde8] sm:$0xff] }
  0xc5   :  { %1160 = vmatprep.subr.mxu1 %v372_v3  ;;  %1092 = vmatpush1.msra.mxu0 %v140_v23  ;;  %v253_v3 = vld [vmem:[#allocation2 + $0x680] sm:$0xff]  ;;  %v484_v23 = vld [vmem:[#allocation2 + $0xdb8] sm:$0xff] }
  0xc6   :  { %1161 = vmatpush1.msra.mxu1 %v371_v5  ;;  %1093 = vmatprep.subr.mxu0 %v134_v24  ;;  %v252_v5 = vld [vmem:[#allocation2 + $0x678] sm:$0xff]  ;;  %v483_v24 = vld [vmem:[#allocation2 + $0xdb0] sm:$0xff] }
  0xc7   :  { %1162 = vmatprep.subr.mxu1 %v365_v25  ;;  %1094 = vmatpush1.msra.mxu0 %v133_v26  ;;  %v246_v25 = vld [vmem:[#allocation2 + $0x648] sm:$0xff]  ;;  %v477_v26 = vld [vmem:[#allocation2 + $0xd80] sm:$0xff] }
  0xc8   :  { %1163 = vmatpush1.msra.mxu1 %v364_v27  ;;  %1095 = vmatprep.subr.mxu0 %v127_v28  ;;  %v245_v27 = vld [vmem:[#allocation2 + $0x640] sm:$0xff]  ;;  %v476_v28 = vld [vmem:[#allocation2 + $0xd78] sm:$0xff] }
  0xc9   :  { %1164 = vmatprep.subr.mxu1 %v358_v60  ;;  %1096 = vmatpush1.msra.mxu0 %v126_v29  ;;  %v239_v60 = vld [vmem:[#allocation2 + $0x610] sm:$0xff]  ;;  %v470_v29 = vld [vmem:[#allocation2 + $0xd48] sm:$0xff] }
  0xca   :  { %1165 = vmatpush1.msra.mxu1 %v357_v0  ;;  %1097 = vmatprep.subr.mxu0 %v120_v30  ;;  %v238_v0 = vld [vmem:[#allocation2 + $0x608] sm:$0xff]  ;;  %v469_v30 = vld [vmem:[#allocation2 + $0xd40] sm:$0xff] }
  0xcb   :  { %1166 = vmatprep.subr.mxu1 %v351_v31  ;;  %1098 = vmatpush1.msra.mxu0 %v119_v32  ;;  %v232_v31 = vld [vmem:[#allocation2 + $0x5d8] sm:$0xff]  ;;  %v463_v32 = vld [vmem:[#allocation2 + $0xd10] sm:$0xff] }
  0xcc   :  { %1167 = vmatpush1.msra.mxu1 %v350_v63  ;;  %1099 = vmatprep.subr.mxu0 %v113_v33  ;;  %v231_v63 = vld [vmem:[#allocation2 + $0x5d0] sm:$0xff]  ;;  %v462_v33 = vld [vmem:[#allocation2 + $0xd08] sm:$0xff] }
  0xcd   :  { %1168 = vmatprep.subr.mxu1 %v344_v34  ;;  %1100 = vmatpush1.msra.mxu0 %v112_v35  ;;  %v225_v34 = vld [vmem:[#allocation2 + $0x5a0] sm:$0xff]  ;;  %v456_v35 = vld [vmem:[#allocation2 + $0xcd8] sm:$0xff] }
  0xce   :  { %1169 = vmatpush1.msra.mxu1 %v343_v36  ;;  %1101 = vmatprep.subr.mxu0 %v106_v37  ;;  %v224_v36 = vld [vmem:[#allocation2 + $0x598] sm:$0xff]  ;;  %v455_v37 = vld [vmem:[#allocation2 + $0xcd0] sm:$0xff] }
  0xcf   :  { %1170 = vmatprep.subr.mxu1 %v337_v38  ;;  %1102 = vmatpush1.msra.mxu0 %v105_v39  ;;  %v218_v38 = vld [vmem:[#allocation2 + $0x568] sm:$0xff]  ;;  %v449_v39 = vld [vmem:[#allocation2 + $0xca0] sm:$0xff] }
  0xd0   :  { %1171 = vmatpush1.msra.mxu1 %v336_v40  ;;  %1103 = vmatprep.subr.mxu0 %v99_v41  ;;  %v217_v40 = vld [vmem:[#allocation2 + $0x560] sm:$0xff]  ;;  %v448_v41 = vld [vmem:[#allocation2 + $0xc98] sm:$0xff] }
  0xd1   :  { %1172 = vmatprep.subr.mxu1 %v330_v42  ;;  %1104 = vmatpush1.msra.mxu0 %v98_v43  ;;  %v211_v42 = vld [vmem:[#allocation2 + $0x530] sm:$0xff]  ;;  %v442_v43 = vld [vmem:[#allocation2 + $0xc68] sm:$0xff] }
  0xd2   :  { %1173 = vmatpush1.msra.mxu1 %v329_v44  ;;  %1105 = vmatprep.subr.mxu0 %v92_v45  ;;  %v210_v44 = vld [vmem:[#allocation2 + $0x528] sm:$0xff]  ;;  %v441_v45 = vld [vmem:[#allocation2 + $0xc60] sm:$0xff] }
  0xd3   :  { %1174 = vmatprep.subr.mxu1 %v323_v46  ;;  %1106 = vmatpush1.msra.mxu0 %v91_v47  ;;  %v204_v46 = vld [vmem:[#allocation2 + $0x4f8] sm:$0xff]  ;;  %v435_v47 = vld [vmem:[#allocation2 + $0xc30] sm:$0xff] }
  0xd4   :  { %1175 = vmatpush1.msra.mxu1 %v322_v48  ;;  %1107 = vmatprep.subr.mxu0 %v85_v49  ;;  %v203_v48 = vld [vmem:[#allocation2 + $0x4f0] sm:$0xff]  ;;  %v434_v49 = vld [vmem:[#allocation2 + $0xc28] sm:$0xff] }
  0xd5   :  { %1176 = vmatprep.subr.mxu1 %v316_v50  ;;  %1108 = vmatpush1.msra.mxu0 %v84_v51  ;;  %v197_v50 = vld [vmem:[#allocation2 + $0x4c0] sm:$0xff]  ;;  %v428_v51 = vld [vmem:[#allocation2 + $0xbf8] sm:$0xff] }
  0xd6   :  { %1177 = vmatpush1.msra.mxu1 %v315_v52  ;;  %1109 = vmatprep.subr.mxu0 %v78_v53  ;;  %v196_v52 = vld [vmem:[#allocation2 + $0x4b8] sm:$0xff]  ;;  %v427_v53 = vld [vmem:[#allocation2 + $0xbf0] sm:$0xff] }
  0xd7   :  { %1178 = vmatprep.subr.mxu1 %v309_v54  ;;  %1110 = vmatpush1.msra.mxu0 %v77_v55  ;;  %v190_v54 = vld [vmem:[#allocation2 + $0x488] sm:$0xff]  ;;  %v421_v55 = vld [vmem:[#allocation2 + $0xbc0] sm:$0xff] }
  0xd8   :  { %1179 = vmatpush1.msra.mxu1 %v308_v56  ;;  %1111 = vmatprep.subr.mxu0 %v71_v57  ;;  %v189_v56 = vld [vmem:[#allocation2 + $0x480] sm:$0xff]  ;;  %v420_v57 = vld [vmem:[#allocation2 + $0xbb8] sm:$0xff] }
  0xd9   :  { %1180 = vmatprep.subr.mxu1 %v302_v58  ;;  %1112 = vmatpush1.msra.mxu0 %v70_v59  ;;  %v183_v58 = vld [vmem:[#allocation2 + $0x450] sm:$0xff]  ;;  %v414_v59 = vld [vmem:[#allocation2 + $0xb88] sm:$0xff] }
  0xda   :  { %1181 = vmatpush1.msra.mxu1 %v301_v61  ;;  %1113 = vmatprep.subr.mxu0 %v64_v62  ;;  %v182_v61 = vld [vmem:[#allocation2 + $0x448] sm:$0xff]  ;;  %v413_v62 = vld [vmem:[#allocation2 + $0xb80] sm:$0xff] }
  0xdb   :  { %1182 = vmatprep.subr.mxu1 %v295_v1  ;;  %1114 = vmatpush1.msra.mxu0 %v63_v2  ;;  %v176_v1 = vld [vmem:[#allocation2 + $0x418] sm:$0xff]  ;;  %v407_v2 = vld [vmem:[#allocation2 + $0xb50] sm:$0xff] }
  0xdc   :  { %1183 = vmatpush1.msra.mxu1 %v294_v4  ;;  %1115 = vmatprep.subr.mxu0 %v57_v7  ;;  %v175_v4 = vld [vmem:[#allocation2 + $0x410] sm:$0xff]  ;;  %v406_v7 = vld [vmem:[#allocation2 + $0xb48] sm:$0xff] }
  0xdd   :  { %1184 = vmatprep.subr.mxu1 %v288_v8  ;;  %1116 = vmatpush1.msra.mxu0 %v56_v9  ;;  %v169_v8 = vld [vmem:[#allocation2 + $0x3e0] sm:$0xff]  ;;  %v400_v9 = vld [vmem:[#allocation2 + $0xb18] sm:$0xff] }
  0xde   :  { %1185 = vmatpush1.msra.mxu1 %v287_v10  ;;  %1117 = vmatprep.subr.mxu0 %v50_v11  ;;  %v168_v10 = vld [vmem:[#allocation2 + $0x3d8] sm:$0xff]  ;;  %v399_v11 = vld [vmem:[#allocation2 + $0xb10] sm:$0xff] }
  0xdf   :  { %1186 = vmatprep.subr.mxu1 %v281_v12  ;;  %1118 = vmatpush1.msra.mxu0 %v49_v13  ;;  %v162_v12 = vld [vmem:[#allocation2 + $0x3a8] sm:$0xff]  ;;  %v393_v13 = vld [vmem:[#allocation2 + $0xae0] sm:$0xff] }
  0xe0   :  { %1187 = vmatpush1.msra.mxu1 %v280_v14  ;;  %1119 = vmatprep.subr.mxu0 %v267_v15  ;;  %v161_v14 = vld [vmem:[#allocation2 + $0x3a0] sm:$0xff]  ;;  %v392_v15 = vld [vmem:[#allocation2 + $0xad8] sm:$0xff] }
  0xe1   :  { %1188 = vmatprep.subr.mxu1 %v274_v16  ;;  %1120 = vmatpush2.msra.mxu0 %v266_v17  ;;  %v386_v16 = vld [vmem:[#allocation2 + $0xaa8] sm:$0xff]  ;;  %v596_v17 = vld [vmem:[#allocation2 + $0x1138] sm:$0x1] }
  0xe2   :  { %1189 = vmatpush1.msra.mxu1 %v273_v18  ;;  %1121 = vmatprep.subr.mxu0 %v260_v19  ;;  %v385_v18 = vld [vmem:[#allocation2 + $0xaa0] sm:$0xff]  ;;  %v1786_v19 = vld [vmem:[%s1879_s0 + $0x8] sm:$0xff] }
  0xe3   :  { %1190 = vmatprep.subr.mxu1 %v491_v20  ;;  %1122 = vmatpush2.msra.mxu0 %v259_v21  ;;  %v595_v20 = vld [vmem:[#allocation2 + $0x1130] sm:$0x1]  ;;  %v1792_v21 = vld [vmem:[%s1879_s0] sm:$0xff] }
  0xe4   :  { %1191 = vmatpush2.msra.mxu1 %v490_v22  ;;  %1123 = vmatprep.subr.mxu0 %v253_v3  ;;  %v589_v22 = vld [vmem:[#allocation2 + $0x1100] sm:$0xff]  ;;  %v588_v3 = vld [vmem:[#allocation2 + $0x10f8] sm:$0xff] }
  0xe5   :  { %1192 = vmatprep.subr.mxu1 %v484_v23  ;;  %1124 = vmatpush2.msra.mxu0 %v252_v5  ;;  %v268_v23 = vld [vmem:[#allocation2 + $0x6f8] sm:$0xff] }
  0xe6   :  { %1193 = vmatpush2.msra.mxu1 %v483_v24  ;;  %1125 = vmatprep.subr.mxu0 %v246_v25  ;;  %v1799_v5 = vld [vmem:[%s1879_s0 + $0x18] sm:$0xff]  ;;  %v582_v24 = vld [vmem:[#allocation2 + $0x10c8] sm:$0xff] }
  0xe7   :  { %1194 = vmatprep.subr.mxu1 %v477_v26  ;;  %1126 = vmatpush2.msra.mxu0 %v245_v27  ;;  %v156_v25 = vld [vmem:[#allocation2 + $0x378] sm:$0xff]  ;;  %v1806_v26 = vld [vmem:[%s1879_s0 + $0x10] sm:$0xff]  ;;  %v581_v27 = vld [vmem:[#allocation2 + $0x10c0] sm:$0xff] }
  0xe8   :  { %1195 = vmatpush2.msra.mxu1 %v476_v28  ;;  %1127 = vmatprep.subr.mxu0 %v239_v60  ;;  %v261_v28 = vld [vmem:[#allocation2 + $0x6c0] sm:$0xff]  ;;  %v575_v60 = vld [vmem:[#allocation2 + $0x1090] sm:$0xff] }
  0xe9   :  { %1196 = vmatprep.subr.mxu1 %v470_v29  ;;  %1128 = vmatpush2.msra.mxu0 %v238_v0  ;;  %v149_v29 = vld [vmem:[#allocation2 + $0x340] sm:$0xff]  ;;  %v574_v0 = vld [vmem:[#allocation2 + $0x1088] sm:$0xff] }
  0xea   :  { %1197 = vmatpush2.msra.mxu1 %v469_v30  ;;  %1129 = vmatprep.subr.mxu0 %v232_v31  ;;  %v254_v30 = vld [vmem:[#allocation2 + $0x688] sm:$0xff]  ;;  %v568_v31 = vld [vmem:[#allocation2 + $0x1058] sm:$0xff] }
  0xeb   :  { %1198 = vmatprep.subr.mxu1 %v463_v32  ;;  %1130 = vmatpush2.msra.mxu0 %v231_v63  ;;  %v142_v32 = vld [vmem:[#allocation2 + $0x308] sm:$0xff]  ;;  %v567_v63 = vld [vmem:[#allocation2 + $0x1050] sm:$0xff] }
  0xec   :  { %1199 = vmatpush2.msra.mxu1 %v462_v33  ;;  %1131 = vmatprep.subr.mxu0 %v225_v34  ;;  %v247_v33 = vld [vmem:[#allocation2 + $0x650] sm:$0xff]  ;;  %v561_v34 = vld [vmem:[#allocation2 + $0x1020] sm:$0xff] }
  0xed   :  { %1200 = vmatprep.subr.mxu1 %v456_v35  ;;  %1132 = vmatpush2.msra.mxu0 %v224_v36  ;;  %v135_v35 = vld [vmem:[#allocation2 + $0x2d0] sm:$0xff]  ;;  %v560_v36 = vld [vmem:[#allocation2 + $0x1018] sm:$0xff] }
  0xee   :  { %1201 = vmatpush2.msra.mxu1 %v455_v37  ;;  %1133 = vmatprep.subr.mxu0 %v218_v38  ;;  %v240_v37 = vld [vmem:[#allocation2 + $0x618] sm:$0xff]  ;;  %v554_v38 = vld [vmem:[#allocation2 + $0xfe8] sm:$0xff] }
  0xef   :  { %1202 = vmatprep.subr.mxu1 %v449_v39  ;;  %1134 = vmatpush2.msra.mxu0 %v217_v40  ;;  %v128_v39 = vld [vmem:[#allocation2 + $0x298] sm:$0xff]  ;;  %v553_v40 = vld [vmem:[#allocation2 + $0xfe0] sm:$0xff] }
  0xf0   :  { %1203 = vmatpush2.msra.mxu1 %v448_v41  ;;  %1135 = vmatprep.subr.mxu0 %v211_v42  ;;  %v233_v41 = vld [vmem:[#allocation2 + $0x5e0] sm:$0xff]  ;;  %v547_v42 = vld [vmem:[#allocation2 + $0xfb0] sm:$0xff] }
  0xf1   :  { %1204 = vmatprep.subr.mxu1 %v442_v43  ;;  %1136 = vmatpush2.msra.mxu0 %v210_v44  ;;  %v121_v43 = vld [vmem:[#allocation2 + $0x260] sm:$0xff]  ;;  %v546_v44 = vld [vmem:[#allocation2 + $0xfa8] sm:$0xff] }
  0xf2   :  { %1205 = vmatpush2.msra.mxu1 %v441_v45  ;;  %1137 = vmatprep.subr.mxu0 %v204_v46  ;;  %v226_v45 = vld [vmem:[#allocation2 + $0x5a8] sm:$0xff]  ;;  %v540_v46 = vld [vmem:[#allocation2 + $0xf78] sm:$0xff] }
  0xf3   :  { %1206 = vmatprep.subr.mxu1 %v435_v47  ;;  %1138 = vmatpush2.msra.mxu0 %v203_v48  ;;  %v114_v47 = vld [vmem:[#allocation2 + $0x228] sm:$0xff]  ;;  %v539_v48 = vld [vmem:[#allocation2 + $0xf70] sm:$0xff] }
  0xf4   :  { %1207 = vmatpush2.msra.mxu1 %v434_v49  ;;  %1139 = vmatprep.subr.mxu0 %v197_v50  ;;  %v219_v49 = vld [vmem:[#allocation2 + $0x570] sm:$0xff]  ;;  %v533_v50 = vld [vmem:[#allocation2 + $0xf40] sm:$0xff] }
  0xf5   :  { %1208 = vmatprep.subr.mxu1 %v428_v51  ;;  %1140 = vmatpush2.msra.mxu0 %v196_v52  ;;  %v107_v51 = vld [vmem:[#allocation2 + $0x1f0] sm:$0xff]  ;;  %v532_v52 = vld [vmem:[#allocation2 + $0xf38] sm:$0xff] }
  0xf6   :  { %1209 = vmatpush2.msra.mxu1 %v427_v53  ;;  %1141 = vmatprep.subr.mxu0 %v190_v54  ;;  %v212_v53 = vld [vmem:[#allocation2 + $0x538] sm:$0xff]  ;;  %v526_v54 = vld [vmem:[#allocation2 + $0xf08] sm:$0xff] }
  0xf7   :  { %1210 = vmatprep.subr.mxu1 %v421_v55  ;;  %1142 = vmatpush2.msra.mxu0 %v189_v56  ;;  %v100_v55 = vld [vmem:[#allocation2 + $0x1b8] sm:$0xff]  ;;  %v525_v56 = vld [vmem:[#allocation2 + $0xf00] sm:$0xff] }
  0xf8   :  { %1211 = vmatpush2.msra.mxu1 %v420_v57  ;;  %1143 = vmatprep.subr.mxu0 %v183_v58  ;;  %v205_v57 = vld [vmem:[#allocation2 + $0x500] sm:$0xff]  ;;  %v519_v58 = vld [vmem:[#allocation2 + $0xed0] sm:$0xff] }
  0xf9   :  { %1212 = vmatprep.subr.mxu1 %v414_v59  ;;  %1144 = vmatpush2.msra.mxu0 %v182_v61  ;;  %v93_v59 = vld [vmem:[#allocation2 + $0x180] sm:$0xff]  ;;  %v518_v61 = vld [vmem:[#allocation2 + $0xec8] sm:$0xff] }
  0xfa   :  { %1213 = vmatpush2.msra.mxu1 %v413_v62  ;;  %1145 = vmatprep.subr.mxu0 %v176_v1  ;;  %v198_v62 = vld [vmem:[#allocation2 + $0x4c8] sm:$0xff]  ;;  %v512_v1 = vld [vmem:[#allocation2 + $0xe98] sm:$0xff] }
  0xfb   :  { %1214 = vmatprep.subr.mxu1 %v407_v2  ;;  %1146 = vmatpush2.msra.mxu0 %v175_v4  ;;  %v86_v2 = vld [vmem:[#allocation2 + $0x148] sm:$0xff]  ;;  %v511_v4 = vld [vmem:[#allocation2 + $0xe90] sm:$0xff] }
  0xfc   :  { %1215 = vmatpush2.msra.mxu1 %v406_v7  ;;  %1147 = vmatprep.subr.mxu0 %v169_v8  ;;  %v191_v7 = vld [vmem:[#allocation2 + $0x490] sm:$0xff]  ;;  %v505_v8 = vld [vmem:[#allocation2 + $0xe60] sm:$0xff] }
  0xfd   :  { %1216 = vmatprep.subr.mxu1 %v400_v9  ;;  %1148 = vmatpush2.msra.mxu0 %v168_v10  ;;  %v79_v9 = vld [vmem:[#allocation2 + $0x110] sm:$0xff]  ;;  %v504_v10 = vld [vmem:[#allocation2 + $0xe58] sm:$0xff] }
  0xfe   :  { %1217 = vmatpush2.msra.mxu1 %v399_v11  ;;  %1149 = vmatprep.subr.mxu0 %v162_v12  ;;  %v184_v11 = vld [vmem:[#allocation2 + $0x458] sm:$0xff]  ;;  %v498_v12 = vld [vmem:[#allocation2 + $0xe28] sm:$0xff] }
  0xff   :  { %1218 = vmatprep.subr.mxu1 %v393_v13  ;;  %1150 = vmatpush2.msra.mxu0 %v161_v14  ;;  %v497_v13 = vld [vmem:[#allocation2 + $0xe20] sm:$0xff]  ;;  %v72_v14 = vld [vmem:[#allocation2 + $0xd8] sm:$0xff] }
 0x100   :  { %1151 = vmatprep.mubr.f32.mxu0 %v1786_v19  ;;  %1219 = vmatpush2.msra.mxu1 %v392_v15  ;;  %v177_v15 = vld [vmem:[#allocation2 + $0x420] sm:$0xff] }
 0x101   :  { %1152 = vmatmul.mubr.f32.vlgmr.msra.gmra.mxu0 %v1792_v21  ;;  %1220 = vmatprep.subr.mxu1 %v386_v16  ;;  %v492_v16 = vld [vmem:[#allocation2 + $0xdf8] sm:$0xff] }
 0x102   :  { %1529 = vmatprep.subr.msk.mxu0 %vm639_vm0, %v596_v17  ;;  %1221 = vmatpush2.msra.mxu1 %v385_v18  ;;  %v65_v17 = vld [vmem:[#allocation2 + $0xa0] sm:$0xff]  ;;  %v380_v18 = vld [vmem:[#allocation2 + $0xa78] sm:$0xff] }
 0x103   :  { %1222 = vmatprep.mubr.f32.mxu1 %v1799_v5  ;;  %1530 = vmatpush1.msk.msra.mxu0 %vm639_vm0, %v595_v20  ;;  %v170_v20 = vld [vmem:[#allocation2 + $0x3e8] sm:$0xff] }
 0x104   :  { %1223 = vmatmul.mubr.f32.vlgmr.msra.gmra.mxu1 %v1806_v26  ;;  %1233 = vmatprep.subr.mxu0 %v589_v22  ;;  %v1813_v22 = vld [vmem:[%s1879_s0 + $0x20] sm:$0xff] }
 0x105   :  { %1234 = vmatpush1.msra.mxu0 %v588_v3  ;;  %1534 = vmatprep.subr.mxu1 %v268_v23  ;;  %v485_v3 = vld [vmem:[#allocation2 + $0xdc0] sm:$0xff]  ;;  %v58_v23 = vld [vmem:[#allocation2 + $0x68] sm:$0xff] }
 0x106   :  { %1235 = vmatprep.subr.mxu0 %v582_v24  ;;  %1535 = vmatpush3.msra.mxu1 %v156_v25  ;;  %v373_v24 = vld [vmem:[#allocation2 + $0xa40] sm:$0xff]  ;;  %v163_v25 = vld [vmem:[#allocation2 + $0x3b0] sm:$0xff] }
 0x107   :  { %1236 = vmatpush1.msra.mxu0 %v581_v27  ;;  %1536 = vmatprep.subr.mxu1 %v261_v28  ;;  %v478_v27 = vld [vmem:[#allocation2 + $0xd88] sm:$0xff]  ;;  %v51_v28 = vld [vmem:[#allocation2 + $0x30] sm:$0xff] }
 0x108   :  { %1237 = vmatprep.subr.mxu0 %v575_v60  ;;  %1537 = vmatpush3.msra.mxu1 %v149_v29  ;;  %v366_v60 = vld [vmem:[#allocation2 + $0xa08] sm:$0xff]  ;;  %v471_v29 = vld [vmem:[#allocation2 + $0xd50] sm:$0xff] }
 0x109   :  { %1238 = vmatpush1.msra.mxu0 %v574_v0  ;;  %1538 = vmatprep.subr.mxu1 %v254_v30  ;;  %v359_v0 = vld [vmem:[#allocation2 + $0x9d0] sm:$0xff]  ;;  %v597_v30 = vld [vmem:[#allocation2 + $0x1140] sm:$0x1] }
 0x10a   :  { %1239 = vmatprep.subr.mxu0 %v568_v31  ;;  %1539 = vmatpush3.msra.mxu1 %v142_v32  ;;  %v464_v31 = vld [vmem:[#allocation2 + $0xd18] sm:$0xff] }
 0x10b   :  { %1240 = vmatpush1.msra.mxu0 %v567_v63  ;;  %1540 = vmatprep.subr.mxu1 %v247_v33  ;;  %v352_v32 = vld [vmem:[#allocation2 + $0x998] sm:$0xff]  ;;  %v600_v63 = vlaneseq  ;;  %v590_v33 = vld [vmem:[#allocation2 + $0x1108] sm:$0xff] }
 0x10c   :  { %1241 = vmatprep.subr.mxu0 %v561_v34  ;;  %1541 = vmatpush3.msra.mxu1 %v135_v35  ;;  %v457_v34 = vld [vmem:[#allocation2 + $0xce0] sm:$0xff] }
 0x10d   :  { %1242 = vmatpush1.msra.mxu0 %v560_v36  ;;  %1542 = vmatprep.subr.mxu1 %v240_v37  ;;  %v345_v35 = vld [vmem:[#allocation2 + $0x960] sm:$0xff]  ;;  %v450_v36 = vld [vmem:[#allocation2 + $0xca8] sm:$0xff] }
 0x10e   :  { %1243 = vmatprep.subr.mxu0 %v554_v38  ;;  %1543 = vmatpush3.msra.mxu1 %v128_v39  ;;  %v338_v37 = vld [vmem:[#allocation2 + $0x928] sm:$0xff]  ;;  %v1822_v38 = vshrl.u32 %v600_v63, 7  ;;  %v443_v39 = vld [vmem:[#allocation2 + $0xc70] sm:$0xff] }
 0x10f   :  { %1244 = vmatpush1.msra.mxu0 %v553_v40  ;;  %1544 = vmatprep.subr.mxu1 %v233_v41  ;;  %v331_v40 = vld [vmem:[#allocation2 + $0x8f0] sm:$0xff]  ;;  %v569_v41 = vld [vmem:[#allocation2 + $0x1060] sm:$0xff] }
 0x110   :  { %1245 = vmatprep.subr.mxu0 %v547_v42  ;;  %1545 = vmatpush3.msra.mxu1 %v121_v43  ;;  %v436_v42 = vld [vmem:[#allocation2 + $0xc38] sm:$0xff] }
 0x111   :  { %1246 = vmatpush1.msra.mxu0 %v546_v44  ;;  %1546 = vmatprep.subr.mxu1 %v226_v45  ;;  %v324_v43 = vld [vmem:[#allocation2 + $0x8b8] sm:$0xff]  ;;  %v602_v44 = vsub.s32 0, %v1822_v38  ;;  %v562_v45 = vld [vmem:[#allocation2 + $0x1028] sm:$0xff] }
 0x112   :  { %1247 = vmatprep.subr.mxu0 %v540_v46  ;;  %1547 = vmatpush3.msra.mxu1 %v114_v47  ;;  %v429_v46 = vld [vmem:[#allocation2 + $0xc00] sm:$0xff]  ;;  %v1828_v47 = vld [vmem:[#allocation4] sm:$0xff] }
 0x113   :  { %1248 = vmatpush1.msra.mxu0 %v539_v48  ;;  %1548 = vmatprep.subr.mxu1 %v219_v49  ;;  %v317_v48 = vld [vmem:[#allocation2 + $0x880] sm:$0xff]  ;;  %v606_v49 = vsub.s32 1, %v1822_v38 }
 0x114   :  { %1249 = vmatprep.subr.mxu0 %v533_v50  ;;  %1549 = vmatpush3.msra.mxu1 %v107_v51  ;;  %v555_v50 = vld [vmem:[#allocation2 + $0xff0] sm:$0xff]  ;;  %v422_v51 = vld [vmem:[#allocation2 + $0xbc8] sm:$0xff] }
 0x115   :  { %1250 = vmatpush1.msra.mxu0 %v532_v52  ;;  %1550 = vmatprep.subr.mxu1 %v212_v53  ;;  %v310_v53 = vld [vmem:[#allocation2 + $0x848] sm:$0xff] }
 0x116   :  { %1251 = vmatprep.subr.mxu0 %v526_v54  ;;  %1551 = vmatpush3.msra.mxu1 %v100_v55  ;;  %v603_v54 = vrot.slane %v1828_v47, %v602_v44  ;;  %v548_v55 = vld [vmem:[#allocation2 + $0xfb8] sm:$0xff] }
 0x117   :  { %1252 = vmatpush1.msra.mxu0 %v525_v56  ;;  %1552 = vmatprep.subr.mxu1 %v205_v57  ;;  %v415_v56 = vld [vmem:[#allocation2 + $0xb90] sm:$0xff] }
 0x118   :  { %1253 = vmatprep.subr.mxu0 %v519_v58  ;;  %1553 = vmatpush3.msra.mxu1 %v93_v59  ;;  %v303_v57 = vld [vmem:[#allocation2 + $0x810] sm:$0xff]  ;;  %v607_v58 = vrot.slane %v1828_v47, %v606_v49  ;;  %v541_v59 = vld [vmem:[#allocation2 + $0xf80] sm:$0xff] }
 0x119   :  { %1254 = vmatpush1.msra.mxu0 %v518_v61  ;;  %1554 = vmatprep.subr.mxu1 %v198_v62  ;;  %v408_v61 = vld [vmem:[#allocation2 + $0xb58] sm:$0xff] }
 0x11a   :  { %1255 = vmatprep.subr.mxu0 %v512_v1  ;;  %1555 = vmatpush3.msra.mxu1 %v86_v2  ;;  %v296_v2 = vld [vmem:[#allocation2 + $0x7d8] sm:$0xff] }
 0x11b   :  { %1256 = vmatpush1.msra.mxu0 %v511_v4  ;;  %1556 = vmatprep.subr.mxu1 %v191_v7  ;;  %v534_v7 = vld [vmem:[#allocation2 + $0xf48] sm:$0xff] }
 0x11c   :  { %1257 = vmatprep.subr.mxu0 %v505_v8  ;;  %1557 = vmatpush3.msra.mxu1 %v79_v9  ;;  %v401_v8 = vld [vmem:[#allocation2 + $0xb20] sm:$0xff] }
 0x11d   :  { %1258 = vmatpush1.msra.mxu0 %v504_v10  ;;  %1558 = vmatprep.subr.mxu1 %v184_v11  ;;  %v727_v52 = vpop.f32.mrf.mxu0  ;;  %v289_v9 = vld [vmem:[#allocation2 + $0x7a0] sm:$0xff]  ;;  %v527_v11 = vld [vmem:[#allocation2 + $0xf10] sm:$0xff] }
 0x11e   :  { %1259 = vmatprep.subr.mxu0 %v498_v12  ;;  %1293 = vmatprep.mubr.f32.mxu0 %v1712_v6  ;;  %v728_v4 = vadd.f32 %v727_v52, %v603_v54  ;;  %v394_v12 = vld [vmem:[#allocation2 + $0xae8] sm:$0xff] }
 0x11f   :  { %1260 = vmatpush1.msra.mxu0 %v497_v13  ;;  %1559 = vmatpush3.msra.mxu1 %v72_v14  ;;  %v729_v62 = vpop.f32.mrf.mxu0  ;;  %v282_v14 = vld [vmem:[#allocation2 + $0x768] sm:$0xff] }
 0x120   :  { %1531 = vmatmul.mubr.msk.f32.vlgmr.msra.gmra.mxu0 %vm635_vm1, %v1813_v22  ;;  %1560 = vmatprep.subr.mxu1 %v177_v15  ;;  %v798_v1 = vpop.f32.mrf.mxu1  ;;  %v730_v10 = vadd.f32 %v729_v62, %v607_v58 }
 0x121   :  { %1569 = vmatprep.subr.mxu0 %v492_v16  ;;  %1561 = vmatpush3.msra.mxu1 %v65_v17  ;;  %v799_v15 = vadd.f32 %v798_v1, %v728_v4  ;;  %v520_v16 = vld [vmem:[#allocation2 + $0xed8] sm:$0xff]  ;;  %v387_v17 = vld [vmem:[#allocation2 + $0xab0] sm:$0xff] }
 0x122   :  { %1570 = vmatpush3.msra.mxu0 %v380_v18  ;;  %1562 = vmatprep.subr.mxu1 %v170_v20  ;;  %v800_v13 = vpop.f32.mrf.mxu1  ;;  %v275_v18 = vld [vmem:[#allocation2 + $0x730] sm:$0xff] }
 0x123   :  { %1571 = vmatprep.subr.mxu0 %v485_v3  ;;  %1563 = vmatpush3.msra.mxu1 %v58_v23  ;;  %v801_v3 = vadd.f32 %v800_v13, %v730_v10  ;;  %v513_v23 = vld [vmem:[#allocation2 + $0xea0] sm:$0xff] }
 0x124   :  { %1572 = vmatpush3.msra.mxu0 %v373_v24  ;;  %1564 = vmatprep.subr.mxu1 %v163_v25 }
 0x125   :  { %1573 = vmatprep.subr.mxu0 %v478_v27  ;;  %1565 = vmatpush3.msra.mxu1 %v51_v28  ;;  %v506_v27 = vld [vmem:[#allocation2 + $0xe68] sm:$0xff] }
 0x126   :  { %1574 = vmatpush3.msra.mxu0 %v366_v60  ;;  %1364 = vmatprep.mubr.f32.mxu1 %v1786_v19  ;;  %v583_v19 = vld [vmem:[#allocation2 + $0x10d0] sm:$0xff] }
 0x127   :  { %1575 = vmatprep.subr.mxu0 %v471_v29  ;;  %1620 = vmatprep.subr.mxu1 %v1712_v6  ;;  %v499_v60 = vld [vmem:[#allocation2 + $0xe30] sm:$0xff] }
 0x128   :  { %1365 = vmatmul.mubr.f32.vlgmr.msra.gmra.mxu1 %v1792_v21  ;;  %1576 = vmatpush3.msra.mxu0 %v359_v0  ;;  %v576_v21 = vld [vmem:[#allocation2 + $0x1098] sm:$0xff] }
 0x129   :  { %1621 = vmatpush3.msk.msra.mxu1 %vm639_vm0, %v597_v30  ;;  %1577 = vmatprep.subr.mxu0 %v464_v31 }
 0x12a   :  { %1622 = vmatprep.subr.mxu1 %v1712_v6  ;;  %1578 = vmatpush3.msra.mxu0 %v352_v32 }
 0x12b   :  { %1623 = vmatpush3.msra.mxu1 %v590_v33  ;;  %1579 = vmatprep.subr.mxu0 %v457_v34 }
 0x12c   :  { %1624 = vmatprep.subr.mxu1 %v1712_v6  ;;  %1580 = vmatpush3.msra.mxu0 %v345_v35 }
 0x12d   :  { %1625 = vmatpush3.msra.mxu1 %v583_v19  ;;  %1581 = vmatprep.subr.mxu0 %v450_v36 }
 0x12e   :  { %1626 = vmatprep.subr.mxu1 %v1712_v6  ;;  %1582 = vmatpush3.msra.mxu0 %v338_v37 }
 0x12f   :  { %1627 = vmatpush3.msra.mxu1 %v576_v21  ;;  %1583 = vmatprep.subr.mxu0 %v443_v39  ;;  %v618_v21 = vsub.s32 4, %v1822_v38  ;;  %v622_v39 = vsub.s32 5, %v1822_v38 }
 0x130   :  { %1628 = vmatprep.subr.mxu1 %v1712_v6  ;;  %1584 = vmatpush3.msra.mxu0 %v331_v40 }
 0x131   :  { %1629 = vmatpush3.msra.mxu1 %v569_v41  ;;  %1585 = vmatprep.subr.mxu0 %v436_v42  ;;  %v619_v41 = vrot.slane %v1828_v47, %v618_v21  ;;  %v623_v42 = vrot.slane %v1828_v47, %v622_v39 }
 0x132   :  { %1630 = vmatprep.subr.mxu1 %v1712_v6  ;;  %1586 = vmatpush3.msra.mxu0 %v324_v43 }
 0x133   :  { %1631 = vmatpush3.msra.mxu1 %v562_v45  ;;  %1587 = vmatprep.subr.mxu0 %v429_v46 }
 0x134   :  { %1632 = vmatprep.subr.mxu1 %v1712_v6  ;;  %1588 = vmatpush3.msra.mxu0 %v317_v48 }
 0x135   :  { %1633 = vmatpush3.msra.mxu1 %v555_v50  ;;  %1589 = vmatprep.subr.mxu0 %v422_v51 }
 0x136   :  { %1634 = vmatprep.subr.mxu1 %v1712_v6  ;;  %1590 = vmatpush3.msra.mxu0 %v310_v53 }
 0x137   :  { %1635 = vmatpush3.msra.mxu1 %v548_v55  ;;  %1591 = vmatprep.subr.mxu0 %v415_v56  ;;  %v626_v56 = vsub.s32 6, %v1822_v38 }
 0x138   :  { %1636 = vmatprep.subr.mxu1 %v1712_v6  ;;  %1592 = vmatpush3.msra.mxu0 %v303_v57 }
 0x139   :  { %1637 = vmatpush3.msra.mxu1 %v541_v59  ;;  %1593 = vmatprep.subr.mxu0 %v408_v61  ;;  %v627_v58 = vrot.slane %v1828_v47, %v626_v56 }
 0x13a   :  { %1638 = vmatprep.subr.mxu1 %v1712_v6  ;;  %1594 = vmatpush3.msra.mxu0 %v296_v2 }
 0x13b   :  { %1639 = vmatpush3.msra.mxu1 %v534_v7  ;;  %1595 = vmatprep.subr.mxu0 %v401_v8 }
 0x13c   :  { %1640 = vmatprep.subr.mxu1 %v1712_v6  ;;  %1596 = vmatpush3.msra.mxu0 %v289_v9 }
 0x13d   :  { %1641 = vmatpush3.msra.mxu1 %v527_v11  ;;  %1597 = vmatprep.subr.mxu0 %v394_v12  ;;  %v869_v20 = vpop.f32.mrf.mxu0 }
 0x13e   :  { %1642 = vmatprep.subr.mxu1 %v1712_v6  ;;  %1598 = vmatpush3.msra.mxu0 %v282_v14  ;;  %v870_v24 = vadd.f32 %v869_v20, %v799_v15 }
 0x13f   :  { %1643 = vmatpush3.msra.mxu1 %v520_v16  ;;  %1599 = vmatprep.subr.mxu0 %v387_v17  ;;  %v871_v25 = vpop.f32.mrf.mxu0 }
 0x140   :  { %1644 = vmatprep.subr.mxu1 %v1712_v6  ;;  %1600 = vmatpush3.msra.mxu0 %v275_v18  ;;  %1510 = vst [vmem:[%s1882_s3] sm:$0xff] %v870_v24  ;;  %v872_v28 = vadd.f32 %v871_v25, %v801_v3 }
 0x141   :  { %1434 = vmatprep.mubr.f32.mxu0 %v1799_v5  ;;  %1645 = vmatpush3.msra.mxu1 %v513_v23  ;;  %v610_v5 = vsub.s32 2, %v1822_v38 }
 0x142   :  { %1435 = vmatmul.mubr.f32.vlgmr.msra.gmra.mxu0 %v1806_v26  ;;  %1646 = vmatprep.subr.mxu1 %v1712_v6  ;;  %1511 = vst [vmem:[%s1882_s3 + $0x8] sm:$0xff] %v872_v28  ;;  %v614_v26 = vsub.s32 3, %v1822_v38 }
 0x143   :  { %1647 = vmatpush3.msra.mxu1 %v506_v27  ;;  %1650 = vmatprep.mubr.msk.f32.mxu1 %vm1713_vm2, %v1712_v6  ;;  %v611_v0 = vrot.slane %v1828_v47, %v610_v5 }
 0x144   :  { %1648 = vmatprep.subr.mxu1 %v1712_v6  ;;  %v615_v30 = vrot.slane %v1828_v47, %v614_v26 }
 0x145   :  { %1649 = vmatpush3.msra.mxu1 %v499_v60 }
 0x146   :  { %1651 = vmatmul.mubr.msk.f32.vlgmr.msra.gmra.mxu1 %vm635_vm1, %v1813_v22 }
 0x163   :  { %v940_v29 = vpop.f32.mrf.mxu1 }
 0x164   :  { %v941_v32 = vadd.f32 %v940_v29, %v611_v0 }
 0x165   :  { %v942_v31 = vpop.f32.mrf.mxu1 }
 0x166   :  { %v943_v33 = vadd.f32 %v942_v31, %v615_v30 }
 0x17f   :  { %v1011_v63 = vpop.f32.mrf.mxu0 }
 0x180   :  { %v1012_v34 = vadd.f32 %v1011_v63, %v941_v32 }
 0x181   :  { %v1013_v35 = vpop.f32.mrf.mxu0 }
 0x182   :  { %v1014_v6 = vadd.f32 %v1013_v35, %v943_v33  ;;  %v1082_v19 = vpop.f32.mrf.mxu1 }
 0x183   :  { %v1083_v36 = vadd.f32 %v1082_v19, %v1012_v34 }
 0x184   :  { %v1084_v37 = vpop.f32.mrf.mxu1 }
 0x185   :  { %1512 = vst [vmem:[%s1882_s3 + $0x10] sm:$0xff] %v1083_v36  ;;  %v1085_v22 = vadd.f32 %v1084_v37, %v1014_v6 }
 0x187   :  { %1513 = vst [vmem:[%s1882_s3 + $0x18] sm:$0xff] %v1085_v22 }
 0x1c1   :  { %v1153_v40 = vpop.f32.mrf.mxu0 }
 0x1c2   :  { %v1154_v45 = vadd.f32 %v1153_v40, %v619_v41 }
 0x1c3   :  { %v1155_v43 = vpop.f32.mrf.mxu0 }
 0x1c4   :  { %v1224_v44 = vpop.f32.mrf.mxu1  ;;  %v1156_v46 = vadd.f32 %v1155_v43, %v623_v42 }
 0x1c5   :  { %v1225_v49 = vadd.f32 %v1224_v44, %v1154_v45 }
 0x1c6   :  { %v1226_v48 = vpop.f32.mrf.mxu1 }
 0x1c7   :  { %v1227_v51 = vadd.f32 %v1226_v48, %v1156_v46 }
 0x1e0   :  { %v1295_v50 = vpop.f32.mrf.mxu0 }
 0x1e1   :  { %v1296_v52 = vadd.f32 %v1295_v50, %v1225_v49 }
 0x1e2   :  { %v1297_v53 = vpop.f32.mrf.mxu0 }
 0x1e3   :  { %1514 = vst [vmem:[%s1882_s3 + $0x20] sm:$0xff] %v1296_v52  ;;  %v1298_v54 = vadd.f32 %v1297_v53, %v1227_v51 }
 0x1e5   :  { %1515 = vst [vmem:[%s1882_s3 + $0x28] sm:$0xff] %v1298_v54 }
 0x1e8   :  { %v1566_v55 = vpop.f32.mrf.mxu1 }
 0x1ea   :  { %v1567_v57 = vpop.f32.mrf.mxu1 }
 0x1eb   :  { %v1568_v59 = vadd.f32 %v1567_v57, %v1566_v55 }
 0x1ed   :  { %v1367_v1 = vadd.f32 %v1568_v59, %v627_v58 }
 0x202   :  { %v1601_v61 = vpop.f32.mrf.mxu0 }
 0x204   :  { %v1602_v62 = vpop.f32.mrf.mxu0 }
 0x205   :  { %v1603_v2 = vadd.f32 %v1602_v62, %v1601_v61 }
 0x206   :  { %v1506_v4 = vpop.f32.mrf.mxu1 }
 0x207   :  { %v1437_v7 = vadd.f32 %v1603_v2, %v1367_v1 }
 0x208   :  { %v1652_v8 = vpop.f32.mrf.mxu1 }
 0x209   :  { %v1507_v9 = vadd.f32 %v1506_v4, %v1437_v7 }
 0x20b   :  { %1516 = vst [vmem:[%s1882_s3 + $0x30] sm:$0xff] %v1507_v9 }
 0x20c   :  { %1521 = vsyncpa [#allocation3], 1 }
 0x20d   :  { %1522 = vsyncpa [#allocation5], 1 }

</bundles_post_ra>
